<compile_context>
chip_gen: v5e
topology: v5e:2x2
jax: 0.10.0
libtpu: 0.0.40
codegen_flags: <defaults>
</compile_context>

<pallas_src>
import functools

import jax
import jax.numpy as jnp
from jax.experimental import pallas as pl
from jax.experimental.pallas import tpu as pltpu

K = 7      # conv kernel size
PAD = 3    # conv padding (same-size output)


def _sam_kernel(w_ref, mask_ref, x_ref, o_ref, *, channels, height, width,
                lowp_gate):
    # w_ref    : SMEM (2*K*K,) f32   -- conv weight flattened as [c_in, kh, kw]
    # mask_ref : VMEM (2*K, H*W) f32 -- rows 0..K-1: column-validity per kw,
    #                                   rows K..2K-1: row-validity per kh
    # x_ref    : VMEM (NB, C, H*W)
    # o_ref    : VMEM (NB, C, H*W)
    hw = height * width

    # ---- Pass 1: channel-wise max / mean (this read of x dies right here). ----
    xi = x_ref[...]                                          # (NB, C, HW)
    max_map = jnp.max(xi, axis=1).astype(jnp.float32)        # exact in any dtype
    avg_map = jnp.sum(xi.astype(jnp.float32), axis=1) * (1.0 / channels)
    maps = (max_map, avg_map)                                # 2 x (NB, HW) f32

    # Hoist all 98 scalar weight reads (SMEM -> sregs) out of the MAC loops.
    wgt = [[[w_ref[c * (K * K) + kh * K + kw] for kw in range(K)]
            for kh in range(K)] for c in range(2)]

    def shift_lanes(v, d):
        # r[..., i] = v[..., (i + d) mod HW]   (XLU lane rotate)
        s = (-d) % hw
        if s == 0:
            return v
        return pltpu.roll(v, shift=s, axis=1)

    # ---- 7x7 conv, kw-outer with per-kh row accumulators (bounded liveness). ----
    rowacc = [None] * K
    for kw in range(K):
        dw = kw - PAD
        if dw == 0:
            shifted = maps
        else:
            cmask = mask_ref[pl.ds(kw, 1), :]                # (1, HW) precomputed
            shifted = tuple(shift_lanes(m, dw) * cmask for m in maps)
        for kh in range(K):
            term = wgt[0][kh][kw] * shifted[0] + wgt[1][kh][kw] * shifted[1]
            rowacc[kh] = term if rowacc[kh] is None else rowacc[kh] + term

    acc = None
    for kh in range(K):
        dh = kh - PAD
        if dh == 0:
            contrib = rowacc[kh]
        else:
            rmask = mask_ref[pl.ds(K + kh, 1), :]            # (1, HW) precomputed
            contrib = shift_lanes(rowacc[kh], dh * width) * rmask
        acc = contrib if acc is None else acc + contrib

    att = jax.nn.sigmoid(acc)                                # (NB, HW) f32

    # ---- Pass 2: re-read x; gating is a pure load -> mul -> cast -> store. ----
    xg = x_ref[...]
    if lowp_gate:
        # bf16 VPU path (v6e / v7x): gate in the input dtype.
        o_ref[...] = (xg * att.astype(xg.dtype)[:, None, :]).astype(o_ref.dtype)
    else:
        o_ref[...] = (xg.astype(jnp.float32) * att[:, None, :]).astype(o_ref.dtype)


def _chip_info():
    """(vmem_capacity_bytes, two_tensorcores, has_bf16_vpu), with safe fallbacks."""
    kind = ""
    try:
        kind = jax.devices()[0].device_kind.lower()
    except Exception:
        pass
    vmem_cap = None
    try:
        info = pltpu.get_tpu_info()
        for attr in ("vmem_capacity_bytes", "vmem_bytes", "vmem_size_bytes"):
            v = getattr(info, attr, None)
            if v:
                vmem_cap = int(v)
                break
    except Exception:
        pass
    is_v5_or_v6 = ("v5" in kind) or ("v6" in kind)
    if vmem_cap is None:
        vmem_cap = 128 * (1 << 20) if is_v5_or_v6 else 64 * (1 << 20)
    # v7x: 64 MiB VMEM / 2 TensorCores.  v5e/v6e: 128 MiB / 1 TC.
    two_tc = (vmem_cap < 100 * (1 << 20)) and not is_v5_or_v6
    has_bf16_vpu = "v5" not in kind            # v6e / v7x VPU handles bf16 natively
    return vmem_cap, two_tc, has_bf16_vpu


def _pick_block_batch(n, per_batch_bytes, per_batch_scratch_bytes, budget_bytes,
                      two_tc):
    """Choose the batch block size NB and required batch padding.

    - keeps both the x block and the conv intermediates under the budget;
    - enforces >=2 grid steps only on 2-TensorCore chips (v7x);
    - prefers a divisor of n (no padding); otherwise pads n up to a multiple of
      NB instead of collapsing to tiny blocks (avoids the prime-N cliff)."""
    cap_block = max(1, budget_bytes // max(1, per_batch_bytes))
    cap_scratch = max(1, budget_bytes // max(1, per_batch_scratch_bytes))
    max_nb = max(1, min(cap_block, cap_scratch))
    if two_tc and n >= 2:
        max_nb = max(1, min(max_nb, (n + 1) // 2))
    nb = min(max_nb, n)
    best_div = 1
    for d in range(1, nb + 1):
        if n % d == 0:
            best_div = d
    if best_div * 2 >= nb:            # close enough to the target -> no padding
        return best_div, 0
    return nb, (-n) % nb


def sam_forward(x, weight):
    """x: (N, C, H, W); weight: (1, 2, K, K) float32."""
    N, C, H, W = x.shape
    HW = H * W
    itemsize = jnp.dtype(x.dtype).itemsize

    vmem_cap, two_tc, has_bf16_vpu = _chip_info()
    budget = (8 << 20) if vmem_cap >= (100 << 20) else (4 << 20)

    per_batch_bytes = C * HW * itemsize
    per_batch_scratch = 16 * HW * 4        # upper bound on live conv f32 intermediates
    NB, pad = _pick_block_batch(N, per_batch_bytes, per_batch_scratch, budget, two_tc)

    x_flat = x.reshape(N, C, HW)                       # lane-dense last dim
    if pad:
        x_flat = jnp.pad(x_flat, ((0, pad), (0, 0), (0, 0)))
    NP = N + pad

    w_flat = weight.reshape(-1).astype(jnp.float32)    # (2*K*K,)

    # Grid-invariant zero-padding validity masks, built once in the wrapper and
    # kept resident in VMEM (same block index every grid step -> DMA'd once).
    col = jnp.arange(HW, dtype=jnp.int32) % W
    row = jnp.arange(HW, dtype=jnp.int32) // W
    col_masks = jnp.stack(
        [((col + (kw - PAD) >= 0) & (col + (kw - PAD) < W)) for kw in range(K)])
    row_masks = jnp.stack(
        [((row + (kh - PAD) >= 0) & (row + (kh - PAD) < H)) for kh in range(K)])
    masks = jnp.concatenate([col_masks, row_masks], axis=0).astype(jnp.float32)

    # VMEM budget: double-buffered in+out blocks + compute scratch + slack.
    block_bytes = NB * C * HW * itemsize
    scratch_bytes = max(NB * C * HW * 4, 16 * NB * HW * 4)
    vmem_limit = max(32 << 20, 4 * block_bytes + scratch_bytes + (4 << 20))
    vmem_limit = min(vmem_limit, (vmem_cap * 3) // 4)

    lowp_gate = bool(has_bf16_vpu and itemsize == 2
                     and jnp.issubdtype(x.dtype, jnp.floating))

    kernel = functools.partial(_sam_kernel, channels=C, height=H, width=W,
                               lowp_gate=lowp_gate)

    out_flat = pl.pallas_call(
        kernel,
        out_shape=jax.ShapeDtypeStruct((NP, C, HW), x.dtype),
        grid=(NP // NB,),
        in_specs=[
            pl.BlockSpec(memory_space=pltpu.MemorySpace.SMEM),   # conv weights
            pl.BlockSpec((2 * K, HW), lambda n: (0, 0)),         # padding masks (resident)
            pl.BlockSpec((NB, C, HW), lambda n: (n, 0, 0)),      # x block
        ],
        out_specs=pl.BlockSpec((NB, C, HW), lambda n: (n, 0, 0)),
        compiler_params=pltpu.CompilerParams(
            dimension_semantics=("parallel",),
            vmem_limit_bytes=int(vmem_limit),
        ),
    )(w_flat, masks, x_flat)

    out_flat = out_flat[:N] if pad else out_flat
    return out_flat.reshape(N, C, H, W)


def sam_reference(x, weight):
    """Pure-JAX reference matching the PyTorch forward."""
    max_map = jnp.max(x, axis=1, keepdims=True)
    avg_map = jnp.mean(x, axis=1, keepdims=True)
    concat = jnp.concatenate([max_map, avg_map], axis=1)
    out = jax.lax.conv_general_dilated(
        concat, weight, window_strides=(1, 1),
        padding=((PAD, PAD), (PAD, PAD)),
        dimension_numbers=("NCHW", "OIHW", "NCHW"))
    return jax.nn.sigmoid(out) * x


if __name__ == "__main__":
    key = jax.random.PRNGKey(0)
    kx, kw_key = jax.random.split(key)

    N, C, H, W = 2, 4, 16, 16
    x = jax.random.normal(kx, (N, C, H, W), dtype=jnp.float32)

    # Deterministic synthetic weight init (PyTorch default: U(-1/sqrt(fan_in), +)),
    # fan_in = 2 * 7 * 7.  bias=False in the module.
    bound = 1.0 / (2.0 * K * K) ** 0.5
    weight = jax.random.uniform(kw_key, (1, 2, K, K), jnp.float32, -bound, bound)

    out = jax.block_until_ready(sam_forward(x, weight))

    ref = sam_reference(x, weight)
    assert jnp.allclose(out, ref, atol=1e-5, rtol=1e-5), "Pallas output mismatch vs reference"
    print("KERNEL_OK")
</pallas_src>

<mosaic_0001>
module attributes {stable_mosaic.version = 11 : i64} {
  func.func @_sam_kernel(%arg0: i32, %arg1: memref<98xf32, #tpu.memory_space<smem>>, %arg2: memref<14x256xf32, #tpu.memory_space<vmem>>, %arg3: memref<1x4x256xf32, #tpu.memory_space<vmem>>, %arg4: memref<1x4x256xf32, #tpu.memory_space<vmem>>) attributes {dimension_semantics = [#tpu.dimension_semantics<parallel>], iteration_bounds = array<i64: 2>, scalar_prefetch = 0 : i64, scratch_operands = 0 : i64, tpu.core_type = #tpu.core_type<tc>, window_params = [{transform_indices = @transform_0, window_bounds = array<i64: 98>}, {pipeline_mode = #tpu.pipeline_mode<synchronous>, transform_indices = @transform_1, window_bounds = array<i64: 14, 256>}, {transform_indices = @transform_2, window_bounds = array<i64: 1, 4, 256>}, {transform_indices = @transform_3, window_bounds = array<i64: 1, 4, 256>}]} {
    %c0 = arith.constant 0 : index
    %c0_0 = arith.constant 0 : index
    %c0_1 = arith.constant 0 : index
    %0 = vector.load %arg3[%c0, %c0_0, %c0_1] : memref<1x4x256xf32, #tpu.memory_space<vmem>>, vector<1x4x256xf32>
    %cst = arith.constant dense<0xFF800000> : vector<1x256xf32>
    %1 = vector.multi_reduction <maximumf>, %0, %cst [1] : vector<1x4x256xf32> to vector<1x256xf32>
    %cst_2 = arith.constant dense<0.000000e+00> : vector<1x256xf32>
    %2 = vector.multi_reduction <add>, %0, %cst_2 [1] : vector<1x4x256xf32> to vector<1x256xf32>
    %cst_3 = arith.constant 2.500000e-01 : f32
    %3 = vector.broadcast %cst_3 : f32 to vector<1x256xf32>
    %4 = arith.mulf %2, %3 : vector<1x256xf32>
    %c0_4 = arith.constant 0 : index
    %5 = memref.load %arg1[%c0_4] : memref<98xf32, #tpu.memory_space<smem>>
    %c1 = arith.constant 1 : index
    %6 = memref.load %arg1[%c1] : memref<98xf32, #tpu.memory_space<smem>>
    %c2 = arith.constant 2 : index
    %7 = memref.load %arg1[%c2] : memref<98xf32, #tpu.memory_space<smem>>
    %c3 = arith.constant 3 : index
    %8 = memref.load %arg1[%c3] : memref<98xf32, #tpu.memory_space<smem>>
    %c4 = arith.constant 4 : index
    %9 = memref.load %arg1[%c4] : memref<98xf32, #tpu.memory_space<smem>>
    %c5 = arith.constant 5 : index
    %10 = memref.load %arg1[%c5] : memref<98xf32, #tpu.memory_space<smem>>
    %c6 = arith.constant 6 : index
    %11 = memref.load %arg1[%c6] : memref<98xf32, #tpu.memory_space<smem>>
    %c7 = arith.constant 7 : index
    %12 = memref.load %arg1[%c7] : memref<98xf32, #tpu.memory_space<smem>>
    %c8 = arith.constant 8 : index
    %13 = memref.load %arg1[%c8] : memref<98xf32, #tpu.memory_space<smem>>
    %c9 = arith.constant 9 : index
    %14 = memref.load %arg1[%c9] : memref<98xf32, #tpu.memory_space<smem>>
    %c10 = arith.constant 10 : index
    %15 = memref.load %arg1[%c10] : memref<98xf32, #tpu.memory_space<smem>>
    %c11 = arith.constant 11 : index
    %16 = memref.load %arg1[%c11] : memref<98xf32, #tpu.memory_space<smem>>
    %c12 = arith.constant 12 : index
    %17 = memref.load %arg1[%c12] : memref<98xf32, #tpu.memory_space<smem>>
    %c13 = arith.constant 13 : index
    %18 = memref.load %arg1[%c13] : memref<98xf32, #tpu.memory_space<smem>>
    %c14 = arith.constant 14 : index
    %19 = memref.load %arg1[%c14] : memref<98xf32, #tpu.memory_space<smem>>
    %c15 = arith.constant 15 : index
    %20 = memref.load %arg1[%c15] : memref<98xf32, #tpu.memory_space<smem>>
    %c16 = arith.constant 16 : index
    %21 = memref.load %arg1[%c16] : memref<98xf32, #tpu.memory_space<smem>>
    %c17 = arith.constant 17 : index
    %22 = memref.load %arg1[%c17] : memref<98xf32, #tpu.memory_space<smem>>
    %c18 = arith.constant 18 : index
    %23 = memref.load %arg1[%c18] : memref<98xf32, #tpu.memory_space<smem>>
    %c19 = arith.constant 19 : index
    %24 = memref.load %arg1[%c19] : memref<98xf32, #tpu.memory_space<smem>>
    %c20 = arith.constant 20 : index
    %25 = memref.load %arg1[%c20] : memref<98xf32, #tpu.memory_space<smem>>
    %c21 = arith.constant 21 : index
    %26 = memref.load %arg1[%c21] : memref<98xf32, #tpu.memory_space<smem>>
    %c22 = arith.constant 22 : index
    %27 = memref.load %arg1[%c22] : memref<98xf32, #tpu.memory_space<smem>>
    %c23 = arith.constant 23 : index
    %28 = memref.load %arg1[%c23] : memref<98xf32, #tpu.memory_space<smem>>
    %c24 = arith.constant 24 : index
    %29 = memref.load %arg1[%c24] : memref<98xf32, #tpu.memory_space<smem>>
    %c25 = arith.constant 25 : index
    %30 = memref.load %arg1[%c25] : memref<98xf32, #tpu.memory_space<smem>>
    %c26 = arith.constant 26 : index
    %31 = memref.load %arg1[%c26] : memref<98xf32, #tpu.memory_space<smem>>
    %c27 = arith.constant 27 : index
    %32 = memref.load %arg1[%c27] : memref<98xf32, #tpu.memory_space<smem>>
    %c28 = arith.constant 28 : index
    %33 = memref.load %arg1[%c28] : memref<98xf32, #tpu.memory_space<smem>>
    %c29 = arith.constant 29 : index
    %34 = memref.load %arg1[%c29] : memref<98xf32, #tpu.memory_space<smem>>
    %c30 = arith.constant 30 : index
    %35 = memref.load %arg1[%c30] : memref<98xf32, #tpu.memory_space<smem>>
    %c31 = arith.constant 31 : index
    %36 = memref.load %arg1[%c31] : memref<98xf32, #tpu.memory_space<smem>>
    %c32 = arith.constant 32 : index
    %37 = memref.load %arg1[%c32] : memref<98xf32, #tpu.memory_space<smem>>
    %c33 = arith.constant 33 : index
    %38 = memref.load %arg1[%c33] : memref<98xf32, #tpu.memory_space<smem>>
    %c34 = arith.constant 34 : index
    %39 = memref.load %arg1[%c34] : memref<98xf32, #tpu.memory_space<smem>>
    %c35 = arith.constant 35 : index
    %40 = memref.load %arg1[%c35] : memref<98xf32, #tpu.memory_space<smem>>
    %c36 = arith.constant 36 : index
    %41 = memref.load %arg1[%c36] : memref<98xf32, #tpu.memory_space<smem>>
    %c37 = arith.constant 37 : index
    %42 = memref.load %arg1[%c37] : memref<98xf32, #tpu.memory_space<smem>>
    %c38 = arith.constant 38 : index
    %43 = memref.load %arg1[%c38] : memref<98xf32, #tpu.memory_space<smem>>
    %c39 = arith.constant 39 : index
    %44 = memref.load %arg1[%c39] : memref<98xf32, #tpu.memory_space<smem>>
    %c40 = arith.constant 40 : index
    %45 = memref.load %arg1[%c40] : memref<98xf32, #tpu.memory_space<smem>>
    %c41 = arith.constant 41 : index
    %46 = memref.load %arg1[%c41] : memref<98xf32, #tpu.memory_space<smem>>
    %c42 = arith.constant 42 : index
    %47 = memref.load %arg1[%c42] : memref<98xf32, #tpu.memory_space<smem>>
    %c43 = arith.constant 43 : index
    %48 = memref.load %arg1[%c43] : memref<98xf32, #tpu.memory_space<smem>>
    %c44 = arith.constant 44 : index
    %49 = memref.load %arg1[%c44] : memref<98xf32, #tpu.memory_space<smem>>
    %c45 = arith.constant 45 : index
    %50 = memref.load %arg1[%c45] : memref<98xf32, #tpu.memory_space<smem>>
    %c46 = arith.constant 46 : index
    %51 = memref.load %arg1[%c46] : memref<98xf32, #tpu.memory_space<smem>>
    %c47 = arith.constant 47 : index
    %52 = memref.load %arg1[%c47] : memref<98xf32, #tpu.memory_space<smem>>
    %c48 = arith.constant 48 : index
    %53 = memref.load %arg1[%c48] : memref<98xf32, #tpu.memory_space<smem>>
    %c49 = arith.constant 49 : index
    %54 = memref.load %arg1[%c49] : memref<98xf32, #tpu.memory_space<smem>>
    %c50 = arith.constant 50 : index
    %55 = memref.load %arg1[%c50] : memref<98xf32, #tpu.memory_space<smem>>
    %c51 = arith.constant 51 : index
    %56 = memref.load %arg1[%c51] : memref<98xf32, #tpu.memory_space<smem>>
    %c52 = arith.constant 52 : index
    %57 = memref.load %arg1[%c52] : memref<98xf32, #tpu.memory_space<smem>>
    %c53 = arith.constant 53 : index
    %58 = memref.load %arg1[%c53] : memref<98xf32, #tpu.memory_space<smem>>
    %c54 = arith.constant 54 : index
    %59 = memref.load %arg1[%c54] : memref<98xf32, #tpu.memory_space<smem>>
    %c55 = arith.constant 55 : index
    %60 = memref.load %arg1[%c55] : memref<98xf32, #tpu.memory_space<smem>>
    %c56 = arith.constant 56 : index
    %61 = memref.load %arg1[%c56] : memref<98xf32, #tpu.memory_space<smem>>
    %c57 = arith.constant 57 : index
    %62 = memref.load %arg1[%c57] : memref<98xf32, #tpu.memory_space<smem>>
    %c58 = arith.constant 58 : index
    %63 = memref.load %arg1[%c58] : memref<98xf32, #tpu.memory_space<smem>>
    %c59 = arith.constant 59 : index
    %64 = memref.load %arg1[%c59] : memref<98xf32, #tpu.memory_space<smem>>
    %c60 = arith.constant 60 : index
    %65 = memref.load %arg1[%c60] : memref<98xf32, #tpu.memory_space<smem>>
    %c61 = arith.constant 61 : index
    %66 = memref.load %arg1[%c61] : memref<98xf32, #tpu.memory_space<smem>>
    %c62 = arith.constant 62 : index
    %67 = memref.load %arg1[%c62] : memref<98xf32, #tpu.memory_space<smem>>
    %c63 = arith.constant 63 : index
    %68 = memref.load %arg1[%c63] : memref<98xf32, #tpu.memory_space<smem>>
    %c64 = arith.constant 64 : index
    %69 = memref.load %arg1[%c64] : memref<98xf32, #tpu.memory_space<smem>>
    %c65 = arith.constant 65 : index
    %70 = memref.load %arg1[%c65] : memref<98xf32, #tpu.memory_space<smem>>
    %c66 = arith.constant 66 : index
    %71 = memref.load %arg1[%c66] : memref<98xf32, #tpu.memory_space<smem>>
    %c67 = arith.constant 67 : index
    %72 = memref.load %arg1[%c67] : memref<98xf32, #tpu.memory_space<smem>>
    %c68 = arith.constant 68 : index
    %73 = memref.load %arg1[%c68] : memref<98xf32, #tpu.memory_space<smem>>
    %c69 = arith.constant 69 : index
    %74 = memref.load %arg1[%c69] : memref<98xf32, #tpu.memory_space<smem>>
    %c70 = arith.constant 70 : index
    %75 = memref.load %arg1[%c70] : memref<98xf32, #tpu.memory_space<smem>>
    %c71 = arith.constant 71 : index
    %76 = memref.load %arg1[%c71] : memref<98xf32, #tpu.memory_space<smem>>
    %c72 = arith.constant 72 : index
    %77 = memref.load %arg1[%c72] : memref<98xf32, #tpu.memory_space<smem>>
    %c73 = arith.constant 73 : index
    %78 = memref.load %arg1[%c73] : memref<98xf32, #tpu.memory_space<smem>>
    %c74 = arith.constant 74 : index
    %79 = memref.load %arg1[%c74] : memref<98xf32, #tpu.memory_space<smem>>
    %c75 = arith.constant 75 : index
    %80 = memref.load %arg1[%c75] : memref<98xf32, #tpu.memory_space<smem>>
    %c76 = arith.constant 76 : index
    %81 = memref.load %arg1[%c76] : memref<98xf32, #tpu.memory_space<smem>>
    %c77 = arith.constant 77 : index
    %82 = memref.load %arg1[%c77] : memref<98xf32, #tpu.memory_space<smem>>
    %c78 = arith.constant 78 : index
    %83 = memref.load %arg1[%c78] : memref<98xf32, #tpu.memory_space<smem>>
    %c79 = arith.constant 79 : index
    %84 = memref.load %arg1[%c79] : memref<98xf32, #tpu.memory_space<smem>>
    %c80 = arith.constant 80 : index
    %85 = memref.load %arg1[%c80] : memref<98xf32, #tpu.memory_space<smem>>
    %c81 = arith.constant 81 : index
    %86 = memref.load %arg1[%c81] : memref<98xf32, #tpu.memory_space<smem>>
    %c82 = arith.constant 82 : index
    %87 = memref.load %arg1[%c82] : memref<98xf32, #tpu.memory_space<smem>>
    %c83 = arith.constant 83 : index
    %88 = memref.load %arg1[%c83] : memref<98xf32, #tpu.memory_space<smem>>
    %c84 = arith.constant 84 : index
    %89 = memref.load %arg1[%c84] : memref<98xf32, #tpu.memory_space<smem>>
    %c85 = arith.constant 85 : index
    %90 = memref.load %arg1[%c85] : memref<98xf32, #tpu.memory_space<smem>>
    %c86 = arith.constant 86 : index
    %91 = memref.load %arg1[%c86] : memref<98xf32, #tpu.memory_space<smem>>
    %c87 = arith.constant 87 : index
    %92 = memref.load %arg1[%c87] : memref<98xf32, #tpu.memory_space<smem>>
    %c88 = arith.constant 88 : index
    %93 = memref.load %arg1[%c88] : memref<98xf32, #tpu.memory_space<smem>>
    %c89 = arith.constant 89 : index
    %94 = memref.load %arg1[%c89] : memref<98xf32, #tpu.memory_space<smem>>
    %c90 = arith.constant 90 : index
    %95 = memref.load %arg1[%c90] : memref<98xf32, #tpu.memory_space<smem>>
    %c91 = arith.constant 91 : index
    %96 = memref.load %arg1[%c91] : memref<98xf32, #tpu.memory_space<smem>>
    %c92 = arith.constant 92 : index
    %97 = memref.load %arg1[%c92] : memref<98xf32, #tpu.memory_space<smem>>
    %c93 = arith.constant 93 : index
    %98 = memref.load %arg1[%c93] : memref<98xf32, #tpu.memory_space<smem>>
    %c94 = arith.constant 94 : index
    %99 = memref.load %arg1[%c94] : memref<98xf32, #tpu.memory_space<smem>>
    %c95 = arith.constant 95 : index
    %100 = memref.load %arg1[%c95] : memref<98xf32, #tpu.memory_space<smem>>
    %c96 = arith.constant 96 : index
    %101 = memref.load %arg1[%c96] : memref<98xf32, #tpu.memory_space<smem>>
    %c97 = arith.constant 97 : index
    %102 = memref.load %arg1[%c97] : memref<98xf32, #tpu.memory_space<smem>>
    %c0_5 = arith.constant 0 : index
    %c0_6 = arith.constant 0 : index
    %103 = vector.load %arg2[%c0_5, %c0_6] : memref<14x256xf32, #tpu.memory_space<vmem>>, vector<1x256xf32>
    %c3_i32 = arith.constant 3 : i32
    %104 = tpu.dynamic_rotate %1 by %c3_i32 dim 1 : vector<1x256xf32>, i32 -> vector<1x256xf32>
    %105 = arith.mulf %104, %103 : vector<1x256xf32>
    %c3_i32_7 = arith.constant 3 : i32
    %106 = tpu.dynamic_rotate %4 by %c3_i32_7 dim 1 : vector<1x256xf32>, i32 -> vector<1x256xf32>
    %107 = arith.mulf %106, %103 : vector<1x256xf32>
    %108 = vector.broadcast %5 : f32 to vector<1x256xf32>
    %109 = arith.mulf %108, %105 : vector<1x256xf32>
    %110 = vector.broadcast %54 : f32 to vector<1x256xf32>
    %111 = arith.mulf %110, %107 : vector<1x256xf32>
    %112 = arith.addf %109, %111 : vector<1x256xf32>
    %113 = vector.broadcast %12 : f32 to vector<1x256xf32>
    %114 = arith.mulf %113, %105 : vector<1x256xf32>
    %115 = vector.broadcast %61 : f32 to vector<1x256xf32>
    %116 = arith.mulf %115, %107 : vector<1x256xf32>
    %117 = arith.addf %114, %116 : vector<1x256xf32>
    %118 = vector.broadcast %19 : f32 to vector<1x256xf32>
    %119 = arith.mulf %118, %105 : vector<1x256xf32>
    %120 = vector.broadcast %68 : f32 to vector<1x256xf32>
    %121 = arith.mulf %120, %107 : vector<1x256xf32>
    %122 = arith.addf %119, %121 : vector<1x256xf32>
    %123 = vector.broadcast %26 : f32 to vector<1x256xf32>
    %124 = arith.mulf %123, %105 : vector<1x256xf32>
    %125 = vector.broadcast %75 : f32 to vector<1x256xf32>
    %126 = arith.mulf %125, %107 : vector<1x256xf32>
    %127 = arith.addf %124, %126 : vector<1x256xf32>
    %128 = vector.broadcast %33 : f32 to vector<1x256xf32>
    %129 = arith.mulf %128, %105 : vector<1x256xf32>
    %130 = vector.broadcast %82 : f32 to vector<1x256xf32>
    %131 = arith.mulf %130, %107 : vector<1x256xf32>
    %132 = arith.addf %129, %131 : vector<1x256xf32>
    %133 = vector.broadcast %40 : f32 to vector<1x256xf32>
    %134 = arith.mulf %133, %105 : vector<1x256xf32>
    %135 = vector.broadcast %89 : f32 to vector<1x256xf32>
    %136 = arith.mulf %135, %107 : vector<1x256xf32>
    %137 = arith.addf %134, %136 : vector<1x256xf32>
    %138 = vector.broadcast %47 : f32 to vector<1x256xf32>
    %139 = arith.mulf %138, %105 : vector<1x256xf32>
    %140 = vector.broadcast %96 : f32 to vector<1x256xf32>
    %141 = arith.mulf %140, %107 : vector<1x256xf32>
    %142 = arith.addf %139, %141 : vector<1x256xf32>
    %c1_8 = arith.constant 1 : index
    %c0_9 = arith.constant 0 : index
    %143 = vector.load %arg2[%c1_8, %c0_9] : memref<14x256xf32, #tpu.memory_space<vmem>>, vector<1x256xf32>
    %c2_i32 = arith.constant 2 : i32
    %144 = tpu.dynamic_rotate %1 by %c2_i32 dim 1 : vector<1x256xf32>, i32 -> vector<1x256xf32>
    %145 = arith.mulf %144, %143 : vector<1x256xf32>
    %c2_i32_10 = arith.constant 2 : i32
    %146 = tpu.dynamic_rotate %4 by %c2_i32_10 dim 1 : vector<1x256xf32>, i32 -> vector<1x256xf32>
    %147 = arith.mulf %146, %143 : vector<1x256xf32>
    %148 = vector.broadcast %6 : f32 to vector<1x256xf32>
    %149 = arith.mulf %148, %145 : vector<1x256xf32>
    %150 = vector.broadcast %55 : f32 to vector<1x256xf32>
    %151 = arith.mulf %150, %147 : vector<1x256xf32>
    %152 = arith.addf %149, %151 : vector<1x256xf32>
    %153 = arith.addf %112, %152 : vector<1x256xf32>
    %154 = vector.broadcast %13 : f32 to vector<1x256xf32>
    %155 = arith.mulf %154, %145 : vector<1x256xf32>
    %156 = vector.broadcast %62 : f32 to vector<1x256xf32>
    %157 = arith.mulf %156, %147 : vector<1x256xf32>
    %158 = arith.addf %155, %157 : vector<1x256xf32>
    %159 = arith.addf %117, %158 : vector<1x256xf32>
    %160 = vector.broadcast %20 : f32 to vector<1x256xf32>
    %161 = arith.mulf %160, %145 : vector<1x256xf32>
    %162 = vector.broadcast %69 : f32 to vector<1x256xf32>
    %163 = arith.mulf %162, %147 : vector<1x256xf32>
    %164 = arith.addf %161, %163 : vector<1x256xf32>
    %165 = arith.addf %122, %164 : vector<1x256xf32>
    %166 = vector.broadcast %27 : f32 to vector<1x256xf32>
    %167 = arith.mulf %166, %145 : vector<1x256xf32>
    %168 = vector.broadcast %76 : f32 to vector<1x256xf32>
    %169 = arith.mulf %168, %147 : vector<1x256xf32>
    %170 = arith.addf %167, %169 : vector<1x256xf32>
    %171 = arith.addf %127, %170 : vector<1x256xf32>
    %172 = vector.broadcast %34 : f32 to vector<1x256xf32>
    %173 = arith.mulf %172, %145 : vector<1x256xf32>
    %174 = vector.broadcast %83 : f32 to vector<1x256xf32>
    %175 = arith.mulf %174, %147 : vector<1x256xf32>
    %176 = arith.addf %173, %175 : vector<1x256xf32>
    %177 = arith.addf %132, %176 : vector<1x256xf32>
    %178 = vector.broadcast %41 : f32 to vector<1x256xf32>
    %179 = arith.mulf %178, %145 : vector<1x256xf32>
    %180 = vector.broadcast %90 : f32 to vector<1x256xf32>
    %181 = arith.mulf %180, %147 : vector<1x256xf32>
    %182 = arith.addf %179, %181 : vector<1x256xf32>
    %183 = arith.addf %137, %182 : vector<1x256xf32>
    %184 = vector.broadcast %48 : f32 to vector<1x256xf32>
    %185 = arith.mulf %184, %145 : vector<1x256xf32>
    %186 = vector.broadcast %97 : f32 to vector<1x256xf32>
    %187 = arith.mulf %186, %147 : vector<1x256xf32>
    %188 = arith.addf %185, %187 : vector<1x256xf32>
    %189 = arith.addf %142, %188 : vector<1x256xf32>
    %c2_11 = arith.constant 2 : index
    %c0_12 = arith.constant 0 : index
    %190 = vector.load %arg2[%c2_11, %c0_12] : memref<14x256xf32, #tpu.memory_space<vmem>>, vector<1x256xf32>
    %c1_i32 = arith.constant 1 : i32
    %191 = tpu.dynamic_rotate %1 by %c1_i32 dim 1 : vector<1x256xf32>, i32 -> vector<1x256xf32>
    %192 = arith.mulf %191, %190 : vector<1x256xf32>
    %c1_i32_13 = arith.constant 1 : i32
    %193 = tpu.dynamic_rotate %4 by %c1_i32_13 dim 1 : vector<1x256xf32>, i32 -> vector<1x256xf32>
    %194 = arith.mulf %193, %190 : vector<1x256xf32>
    %195 = vector.broadcast %7 : f32 to vector<1x256xf32>
    %196 = arith.mulf %195, %192 : vector<1x256xf32>
    %197 = vector.broadcast %56 : f32 to vector<1x256xf32>
    %198 = arith.mulf %197, %194 : vector<1x256xf32>
    %199 = arith.addf %196, %198 : vector<1x256xf32>
    %200 = arith.addf %153, %199 : vector<1x256xf32>
    %201 = vector.broadcast %14 : f32 to vector<1x256xf32>
    %202 = arith.mulf %201, %192 : vector<1x256xf32>
    %203 = vector.broadcast %63 : f32 to vector<1x256xf32>
    %204 = arith.mulf %203, %194 : vector<1x256xf32>
    %205 = arith.addf %202, %204 : vector<1x256xf32>
    %206 = arith.addf %159, %205 : vector<1x256xf32>
    %207 = vector.broadcast %21 : f32 to vector<1x256xf32>
    %208 = arith.mulf %207, %192 : vector<1x256xf32>
    %209 = vector.broadcast %70 : f32 to vector<1x256xf32>
    %210 = arith.mulf %209, %194 : vector<1x256xf32>
    %211 = arith.addf %208, %210 : vector<1x256xf32>
    %212 = arith.addf %165, %211 : vector<1x256xf32>
    %213 = vector.broadcast %28 : f32 to vector<1x256xf32>
    %214 = arith.mulf %213, %192 : vector<1x256xf32>
    %215 = vector.broadcast %77 : f32 to vector<1x256xf32>
    %216 = arith.mulf %215, %194 : vector<1x256xf32>
    %217 = arith.addf %214, %216 : vector<1x256xf32>
    %218 = arith.addf %171, %217 : vector<1x256xf32>
    %219 = vector.broadcast %35 : f32 to vector<1x256xf32>
    %220 = arith.mulf %219, %192 : vector<1x256xf32>
    %221 = vector.broadcast %84 : f32 to vector<1x256xf32>
    %222 = arith.mulf %221, %194 : vector<1x256xf32>
    %223 = arith.addf %220, %222 : vector<1x256xf32>
    %224 = arith.addf %177, %223 : vector<1x256xf32>
    %225 = vector.broadcast %42 : f32 to vector<1x256xf32>
    %226 = arith.mulf %225, %192 : vector<1x256xf32>
    %227 = vector.broadcast %91 : f32 to vector<1x256xf32>
    %228 = arith.mulf %227, %194 : vector<1x256xf32>
    %229 = arith.addf %226, %228 : vector<1x256xf32>
    %230 = arith.addf %183, %229 : vector<1x256xf32>
    %231 = vector.broadcast %49 : f32 to vector<1x256xf32>
    %232 = arith.mulf %231, %192 : vector<1x256xf32>
    %233 = vector.broadcast %98 : f32 to vector<1x256xf32>
    %234 = arith.mulf %233, %194 : vector<1x256xf32>
    %235 = arith.addf %232, %234 : vector<1x256xf32>
    %236 = arith.addf %189, %235 : vector<1x256xf32>
    %237 = vector.broadcast %8 : f32 to vector<1x256xf32>
    %238 = arith.mulf %237, %1 : vector<1x256xf32>
    %239 = vector.broadcast %57 : f32 to vector<1x256xf32>
    %240 = arith.mulf %239, %4 : vector<1x256xf32>
    %241 = arith.addf %238, %240 : vector<1x256xf32>
    %242 = arith.addf %200, %241 : vector<1x256xf32>
    %243 = vector.broadcast %15 : f32 to vector<1x256xf32>
    %244 = arith.mulf %243, %1 : vector<1x256xf32>
    %245 = vector.broadcast %64 : f32 to vector<1x256xf32>
    %246 = arith.mulf %245, %4 : vector<1x256xf32>
    %247 = arith.addf %244, %246 : vector<1x256xf32>
    %248 = arith.addf %206, %247 : vector<1x256xf32>
    %249 = vector.broadcast %22 : f32 to vector<1x256xf32>
    %250 = arith.mulf %249, %1 : vector<1x256xf32>
    %251 = vector.broadcast %71 : f32 to vector<1x256xf32>
    %252 = arith.mulf %251, %4 : vector<1x256xf32>
    %253 = arith.addf %250, %252 : vector<1x256xf32>
    %254 = arith.addf %212, %253 : vector<1x256xf32>
    %255 = vector.broadcast %29 : f32 to vector<1x256xf32>
    %256 = arith.mulf %255, %1 : vector<1x256xf32>
    %257 = vector.broadcast %78 : f32 to vector<1x256xf32>
    %258 = arith.mulf %257, %4 : vector<1x256xf32>
    %259 = arith.addf %256, %258 : vector<1x256xf32>
    %260 = arith.addf %218, %259 : vector<1x256xf32>
    %261 = vector.broadcast %36 : f32 to vector<1x256xf32>
    %262 = arith.mulf %261, %1 : vector<1x256xf32>
    %263 = vector.broadcast %85 : f32 to vector<1x256xf32>
    %264 = arith.mulf %263, %4 : vector<1x256xf32>
    %265 = arith.addf %262, %264 : vector<1x256xf32>
    %266 = arith.addf %224, %265 : vector<1x256xf32>
    %267 = vector.broadcast %43 : f32 to vector<1x256xf32>
    %268 = arith.mulf %267, %1 : vector<1x256xf32>
    %269 = vector.broadcast %92 : f32 to vector<1x256xf32>
    %270 = arith.mulf %269, %4 : vector<1x256xf32>
    %271 = arith.addf %268, %270 : vector<1x256xf32>
    %272 = arith.addf %230, %271 : vector<1x256xf32>
    %273 = vector.broadcast %50 : f32 to vector<1x256xf32>
    %274 = arith.mulf %273, %1 : vector<1x256xf32>
    %275 = vector.broadcast %99 : f32 to vector<1x256xf32>
    %276 = arith.mulf %275, %4 : vector<1x256xf32>
    %277 = arith.addf %274, %276 : vector<1x256xf32>
    %278 = arith.addf %236, %277 : vector<1x256xf32>
    %c4_14 = arith.constant 4 : index
    %c0_15 = arith.constant 0 : index
    %279 = vector.load %arg2[%c4_14, %c0_15] : memref<14x256xf32, #tpu.memory_space<vmem>>, vector<1x256xf32>
    %c255_i32 = arith.constant 255 : i32
    %280 = tpu.dynamic_rotate %1 by %c255_i32 dim 1 : vector<1x256xf32>, i32 -> vector<1x256xf32>
    %281 = arith.mulf %280, %279 : vector<1x256xf32>
    %c255_i32_16 = arith.constant 255 : i32
    %282 = tpu.dynamic_rotate %4 by %c255_i32_16 dim 1 : vector<1x256xf32>, i32 -> vector<1x256xf32>
    %283 = arith.mulf %282, %279 : vector<1x256xf32>
    %284 = vector.broadcast %9 : f32 to vector<1x256xf32>
    %285 = arith.mulf %284, %281 : vector<1x256xf32>
    %286 = vector.broadcast %58 : f32 to vector<1x256xf32>
    %287 = arith.mulf %286, %283 : vector<1x256xf32>
    %288 = arith.addf %285, %287 : vector<1x256xf32>
    %289 = arith.addf %242, %288 : vector<1x256xf32>
    %290 = vector.broadcast %16 : f32 to vector<1x256xf32>
    %291 = arith.mulf %290, %281 : vector<1x256xf32>
    %292 = vector.broadcast %65 : f32 to vector<1x256xf32>
    %293 = arith.mulf %292, %283 : vector<1x256xf32>
    %294 = arith.addf %291, %293 : vector<1x256xf32>
    %295 = arith.addf %248, %294 : vector<1x256xf32>
    %296 = vector.broadcast %23 : f32 to vector<1x256xf32>
    %297 = arith.mulf %296, %281 : vector<1x256xf32>
    %298 = vector.broadcast %72 : f32 to vector<1x256xf32>
    %299 = arith.mulf %298, %283 : vector<1x256xf32>
    %300 = arith.addf %297, %299 : vector<1x256xf32>
    %301 = arith.addf %254, %300 : vector<1x256xf32>
    %302 = vector.broadcast %30 : f32 to vector<1x256xf32>
    %303 = arith.mulf %302, %281 : vector<1x256xf32>
    %304 = vector.broadcast %79 : f32 to vector<1x256xf32>
    %305 = arith.mulf %304, %283 : vector<1x256xf32>
    %306 = arith.addf %303, %305 : vector<1x256xf32>
    %307 = arith.addf %260, %306 : vector<1x256xf32>
    %308 = vector.broadcast %37 : f32 to vector<1x256xf32>
    %309 = arith.mulf %308, %281 : vector<1x256xf32>
    %310 = vector.broadcast %86 : f32 to vector<1x256xf32>
    %311 = arith.mulf %310, %283 : vector<1x256xf32>
    %312 = arith.addf %309, %311 : vector<1x256xf32>
    %313 = arith.addf %266, %312 : vector<1x256xf32>
    %314 = vector.broadcast %44 : f32 to vector<1x256xf32>
    %315 = arith.mulf %314, %281 : vector<1x256xf32>
    %316 = vector.broadcast %93 : f32 to vector<1x256xf32>
    %317 = arith.mulf %316, %283 : vector<1x256xf32>
    %318 = arith.addf %315, %317 : vector<1x256xf32>
    %319 = arith.addf %272, %318 : vector<1x256xf32>
    %320 = vector.broadcast %51 : f32 to vector<1x256xf32>
    %321 = arith.mulf %320, %281 : vector<1x256xf32>
    %322 = vector.broadcast %100 : f32 to vector<1x256xf32>
    %323 = arith.mulf %322, %283 : vector<1x256xf32>
    %324 = arith.addf %321, %323 : vector<1x256xf32>
    %325 = arith.addf %278, %324 : vector<1x256xf32>
    %c5_17 = arith.constant 5 : index
    %c0_18 = arith.constant 0 : index
    %326 = vector.load %arg2[%c5_17, %c0_18] : memref<14x256xf32, #tpu.memory_space<vmem>>, vector<1x256xf32>
    %c254_i32 = arith.constant 254 : i32
    %327 = tpu.dynamic_rotate %1 by %c254_i32 dim 1 : vector<1x256xf32>, i32 -> vector<1x256xf32>
    %328 = arith.mulf %327, %326 : vector<1x256xf32>
    %c254_i32_19 = arith.constant 254 : i32
    %329 = tpu.dynamic_rotate %4 by %c254_i32_19 dim 1 : vector<1x256xf32>, i32 -> vector<1x256xf32>
    %330 = arith.mulf %329, %326 : vector<1x256xf32>
    %331 = vector.broadcast %10 : f32 to vector<1x256xf32>
    %332 = arith.mulf %331, %328 : vector<1x256xf32>
    %333 = vector.broadcast %59 : f32 to vector<1x256xf32>
    %334 = arith.mulf %333, %330 : vector<1x256xf32>
    %335 = arith.addf %332, %334 : vector<1x256xf32>
    %336 = arith.addf %289, %335 : vector<1x256xf32>
    %337 = vector.broadcast %17 : f32 to vector<1x256xf32>
    %338 = arith.mulf %337, %328 : vector<1x256xf32>
    %339 = vector.broadcast %66 : f32 to vector<1x256xf32>
    %340 = arith.mulf %339, %330 : vector<1x256xf32>
    %341 = arith.addf %338, %340 : vector<1x256xf32>
    %342 = arith.addf %295, %341 : vector<1x256xf32>
    %343 = vector.broadcast %24 : f32 to vector<1x256xf32>
    %344 = arith.mulf %343, %328 : vector<1x256xf32>
    %345 = vector.broadcast %73 : f32 to vector<1x256xf32>
    %346 = arith.mulf %345, %330 : vector<1x256xf32>
    %347 = arith.addf %344, %346 : vector<1x256xf32>
    %348 = arith.addf %301, %347 : vector<1x256xf32>
    %349 = vector.broadcast %31 : f32 to vector<1x256xf32>
    %350 = arith.mulf %349, %328 : vector<1x256xf32>
    %351 = vector.broadcast %80 : f32 to vector<1x256xf32>
    %352 = arith.mulf %351, %330 : vector<1x256xf32>
    %353 = arith.addf %350, %352 : vector<1x256xf32>
    %354 = arith.addf %307, %353 : vector<1x256xf32>
    %355 = vector.broadcast %38 : f32 to vector<1x256xf32>
    %356 = arith.mulf %355, %328 : vector<1x256xf32>
    %357 = vector.broadcast %87 : f32 to vector<1x256xf32>
    %358 = arith.mulf %357, %330 : vector<1x256xf32>
    %359 = arith.addf %356, %358 : vector<1x256xf32>
    %360 = arith.addf %313, %359 : vector<1x256xf32>
    %361 = vector.broadcast %45 : f32 to vector<1x256xf32>
    %362 = arith.mulf %361, %328 : vector<1x256xf32>
    %363 = vector.broadcast %94 : f32 to vector<1x256xf32>
    %364 = arith.mulf %363, %330 : vector<1x256xf32>
    %365 = arith.addf %362, %364 : vector<1x256xf32>
    %366 = arith.addf %319, %365 : vector<1x256xf32>
    %367 = vector.broadcast %52 : f32 to vector<1x256xf32>
    %368 = arith.mulf %367, %328 : vector<1x256xf32>
    %369 = vector.broadcast %101 : f32 to vector<1x256xf32>
    %370 = arith.mulf %369, %330 : vector<1x256xf32>
    %371 = arith.addf %368, %370 : vector<1x256xf32>
    %372 = arith.addf %325, %371 : vector<1x256xf32>
    %c6_20 = arith.constant 6 : index
    %c0_21 = arith.constant 0 : index
    %373 = vector.load %arg2[%c6_20, %c0_21] : memref<14x256xf32, #tpu.memory_space<vmem>>, vector<1x256xf32>
    %c253_i32 = arith.constant 253 : i32
    %374 = tpu.dynamic_rotate %1 by %c253_i32 dim 1 : vector<1x256xf32>, i32 -> vector<1x256xf32>
    %375 = arith.mulf %374, %373 : vector<1x256xf32>
    %c253_i32_22 = arith.constant 253 : i32
    %376 = tpu.dynamic_rotate %4 by %c253_i32_22 dim 1 : vector<1x256xf32>, i32 -> vector<1x256xf32>
    %377 = arith.mulf %376, %373 : vector<1x256xf32>
    %378 = vector.broadcast %11 : f32 to vector<1x256xf32>
    %379 = arith.mulf %378, %375 : vector<1x256xf32>
    %380 = vector.broadcast %60 : f32 to vector<1x256xf32>
    %381 = arith.mulf %380, %377 : vector<1x256xf32>
    %382 = arith.addf %379, %381 : vector<1x256xf32>
    %383 = arith.addf %336, %382 : vector<1x256xf32>
    %384 = vector.broadcast %18 : f32 to vector<1x256xf32>
    %385 = arith.mulf %384, %375 : vector<1x256xf32>
    %386 = vector.broadcast %67 : f32 to vector<1x256xf32>
    %387 = arith.mulf %386, %377 : vector<1x256xf32>
    %388 = arith.addf %385, %387 : vector<1x256xf32>
    %389 = arith.addf %342, %388 : vector<1x256xf32>
    %390 = vector.broadcast %25 : f32 to vector<1x256xf32>
    %391 = arith.mulf %390, %375 : vector<1x256xf32>
    %392 = vector.broadcast %74 : f32 to vector<1x256xf32>
    %393 = arith.mulf %392, %377 : vector<1x256xf32>
    %394 = arith.addf %391, %393 : vector<1x256xf32>
    %395 = arith.addf %348, %394 : vector<1x256xf32>
    %396 = vector.broadcast %32 : f32 to vector<1x256xf32>
    %397 = arith.mulf %396, %375 : vector<1x256xf32>
    %398 = vector.broadcast %81 : f32 to vector<1x256xf32>
    %399 = arith.mulf %398, %377 : vector<1x256xf32>
    %400 = arith.addf %397, %399 : vector<1x256xf32>
    %401 = arith.addf %354, %400 : vector<1x256xf32>
    %402 = vector.broadcast %39 : f32 to vector<1x256xf32>
    %403 = arith.mulf %402, %375 : vector<1x256xf32>
    %404 = vector.broadcast %88 : f32 to vector<1x256xf32>
    %405 = arith.mulf %404, %377 : vector<1x256xf32>
    %406 = arith.addf %403, %405 : vector<1x256xf32>
    %407 = arith.addf %360, %406 : vector<1x256xf32>
    %408 = vector.broadcast %46 : f32 to vector<1x256xf32>
    %409 = arith.mulf %408, %375 : vector<1x256xf32>
    %410 = vector.broadcast %95 : f32 to vector<1x256xf32>
    %411 = arith.mulf %410, %377 : vector<1x256xf32>
    %412 = arith.addf %409, %411 : vector<1x256xf32>
    %413 = arith.addf %366, %412 : vector<1x256xf32>
    %414 = vector.broadcast %53 : f32 to vector<1x256xf32>
    %415 = arith.mulf %414, %375 : vector<1x256xf32>
    %416 = vector.broadcast %102 : f32 to vector<1x256xf32>
    %417 = arith.mulf %416, %377 : vector<1x256xf32>
    %418 = arith.addf %415, %417 : vector<1x256xf32>
    %419 = arith.addf %372, %418 : vector<1x256xf32>
    %c7_23 = arith.constant 7 : index
    %c0_24 = arith.constant 0 : index
    %420 = vector.load %arg2[%c7_23, %c0_24] : memref<14x256xf32, #tpu.memory_space<vmem>>, vector<1x256xf32>
    %c48_i32 = arith.constant 48 : i32
    %421 = tpu.dynamic_rotate %383 by %c48_i32 dim 1 : vector<1x256xf32>, i32 -> vector<1x256xf32>
    %422 = arith.mulf %421, %420 : vector<1x256xf32>
    %c8_25 = arith.constant 8 : index
    %c0_26 = arith.constant 0 : index
    %423 = vector.load %arg2[%c8_25, %c0_26] : memref<14x256xf32, #tpu.memory_space<vmem>>, vector<1x256xf32>
    %c32_i32 = arith.constant 32 : i32
    %424 = tpu.dynamic_rotate %389 by %c32_i32 dim 1 : vector<1x256xf32>, i32 -> vector<1x256xf32>
    %425 = arith.mulf %424, %423 : vector<1x256xf32>
    %426 = arith.addf %422, %425 : vector<1x256xf32>
    %c9_27 = arith.constant 9 : index
    %c0_28 = arith.constant 0 : index
    %427 = vector.load %arg2[%c9_27, %c0_28] : memref<14x256xf32, #tpu.memory_space<vmem>>, vector<1x256xf32>
    %c16_i32 = arith.constant 16 : i32
    %428 = tpu.dynamic_rotate %395 by %c16_i32 dim 1 : vector<1x256xf32>, i32 -> vector<1x256xf32>
    %429 = arith.mulf %428, %427 : vector<1x256xf32>
    %430 = arith.addf %426, %429 : vector<1x256xf32>
    %431 = arith.addf %430, %401 : vector<1x256xf32>
    %c11_29 = arith.constant 11 : index
    %c0_30 = arith.constant 0 : index
    %432 = vector.load %arg2[%c11_29, %c0_30] : memref<14x256xf32, #tpu.memory_space<vmem>>, vector<1x256xf32>
    %c240_i32 = arith.constant 240 : i32
    %433 = tpu.dynamic_rotate %407 by %c240_i32 dim 1 : vector<1x256xf32>, i32 -> vector<1x256xf32>
    %434 = arith.mulf %433, %432 : vector<1x256xf32>
    %435 = arith.addf %431, %434 : vector<1x256xf32>
    %c12_31 = arith.constant 12 : index
    %c0_32 = arith.constant 0 : index
    %436 = vector.load %arg2[%c12_31, %c0_32] : memref<14x256xf32, #tpu.memory_space<vmem>>, vector<1x256xf32>
    %c224_i32 = arith.constant 224 : i32
    %437 = tpu.dynamic_rotate %413 by %c224_i32 dim 1 : vector<1x256xf32>, i32 -> vector<1x256xf32>
    %438 = arith.mulf %437, %436 : vector<1x256xf32>
    %439 = arith.addf %435, %438 : vector<1x256xf32>
    %c13_33 = arith.constant 13 : index
    %c0_34 = arith.constant 0 : index
    %440 = vector.load %arg2[%c13_33, %c0_34] : memref<14x256xf32, #tpu.memory_space<vmem>>, vector<1x256xf32>
    %c208_i32 = arith.constant 208 : i32
    %441 = tpu.dynamic_rotate %419 by %c208_i32 dim 1 : vector<1x256xf32>, i32 -> vector<1x256xf32>
    %442 = arith.mulf %441, %440 : vector<1x256xf32>
    %443 = arith.addf %439, %442 : vector<1x256xf32>
    %444 = arith.negf %443 : vector<1x256xf32>
    %445 = math.exp %444 : vector<1x256xf32>
    %cst_35 = arith.constant 1.000000e+00 : f32
    %446 = vector.broadcast %cst_35 : f32 to vector<1x256xf32>
    %447 = arith.addf %446, %445 : vector<1x256xf32>
    %448 = arith.divf %446, %447 : vector<1x256xf32>
    %c0_36 = arith.constant 0 : index
    %c0_37 = arith.constant 0 : index
    %c0_38 = arith.constant 0 : index
    %449 = vector.load %arg3[%c0_36, %c0_37, %c0_38] : memref<1x4x256xf32, #tpu.memory_space<vmem>>, vector<1x4x256xf32>
    %450 = vector.shape_cast %448 : vector<1x256xf32> to vector<1x1x256xf32>
    %451 = vector.broadcast %450 : vector<1x1x256xf32> to vector<1x4x256xf32>
    %452 = arith.mulf %449, %451 : vector<1x4x256xf32>
    %c0_39 = arith.constant 0 : index
    %c0_40 = arith.constant 0 : index
    %c0_41 = arith.constant 0 : index
    %453 = vector.load %arg4[%c0_39, %c0_40, %c0_41] : memref<1x4x256xf32, #tpu.memory_space<vmem>>, vector<1x4x256xf32>
    tpu.vector_store %arg4[%c0_39, %c0_40, %c0_41], %452 {strides = array<i32>} : memref<1x4x256xf32, #tpu.memory_space<vmem>>, vector<1x4x256xf32>,
    return
  }
  func.func @transform_0(%arg0: i32) -> i32 {
    %c0_i32 = arith.constant 0 : i32
    %c0_i32_0 = arith.constant 0 : i32
    return %c0_i32 : i32
  }
  func.func @transform_1(%arg0: i32) -> (i32, i32) {
    %c0_i32 = arith.constant 0 : i32
    %c0_i32_0 = arith.constant 0 : i32
    %c0_i32_1 = arith.constant 0 : i32
    return %c0_i32, %c0_i32_0 : i32, i32
  }
  func.func @transform_2(%arg0: i32) -> (i32, i32, i32) {
    %c0_i32 = arith.constant 0 : i32
    %c0_i32_0 = arith.constant 0 : i32
    %c0_i32_1 = arith.constant 0 : i32
    return %arg0, %c0_i32, %c0_i32_0 : i32, i32, i32
  }
  func.func @transform_3(%arg0: i32) -> (i32, i32, i32) {
    %c0_i32 = arith.constant 0 : i32
    %c0_i32_0 = arith.constant 0 : i32
    %c0_i32_1 = arith.constant 0 : i32
    return %arg0, %c0_i32, %c0_i32_0 : i32, i32, i32
  }
}

</mosaic_0001>

<bundles_post_ra>
// kernel: tpu_custom_call.1
= control target key start
LH: loop header
LB: loop body
LE: loop exit
PB: predicated region body
PF: predicated region fallthrough
CT: control target
= control target key end

     0   :  { %s2886_s0 = inlined_call_operand.hbm [shape: f32[98], index: 0, kind: input, shape index: {}]   ;;  %s2887_s1 = inlined_call_operand.hbm [shape: f32[14,256], index: 1, kind: input, shape index: {}]   ;;  %s2888_s2 = inlined_call_operand.hbm [shape: f32[2,4,256], index: 2, kind: input, shape index: {}]   ;;  %s2889_s3 = inlined_call_operand.hbm [shape: f32[2,4,256], index: 3, kind: output, shape index: {}]  }
   0x1   :  { %2963 = sst [smem:[#allocation46_spill]] %s2886_s0 }
   0x2   :  { %2964 = sst [smem:[#allocation47_spill]] %s2887_s1 }
   0x3   :  { %2965 = sst [smem:[#allocation48_spill]] %s2888_s2 }
   0x4   :  { %2966 = sst [smem:[#allocation49_spill]] %s2889_s3 }
   0x5   :  { %8 = vsyncpa [#allocation5], 0 }
   0x6   :  { %9 = vsyncpa [#allocation3], 0 }
   0x7   :  { %10 = vsyncpa [#allocation8], 0 }
   0x8   :  { %12 = vsyncpa [#allocation8 + $0x1], 0 }
   0x9   :  { %13 = vsyncpa [#allocation4], 0 }
   0xa   :  { %15 = vsyncpa [#allocation4 + $0x1], 0  ;;  %s1643_s12 = smov 0   ;;  %s1645_s13 = smov 0  }
   0xb   :  { %s1647_s14 = smov 0   ;;  %s1649_s15 = smov 0  }
   0xc LB: > { %2967 = sst [smem:[#allocation14_spill]] %s1593_s12  ;;  %s1664_s16 = sadd.s32 4294967295, %s1605_s15   ;;  %s1605_s15 = sphi %s1649_s15, %s3127_s15   ;;  %s1601_s14 = sphi %s1647_s14, %s3130_s14   ;;  %s1597_s13 = sphi %s1645_s13, %s3129_s13   ;;  %s1593_s12 = sphi %s1643_s12, %s3128_s12  }
   0xd   : > { %2968 = sst [smem:[#allocation15_spill]] %s1597_s13  ;;  %s1248_s17 = sadd.s32 4294967294, %s1605_s15  }
   0xe   : > { %2969 = sst [smem:[#allocation16_spill]] %s1601_s14  ;;  %p83_p0 = scmp.ne.s32.totalorder %s1597_s13, %s1593_s12 }
   0xf   : > { %2970 = sst [smem:[#allocation17_spill]] %s1605_s15  ;;  %p84_p1 = scmp.eq.s32.totalorder %s1664_s16, 0 }
  0x10   : > { %2971 = sst [smem:[#allocation18_spill]] %s1664_s16  ;;  %p107_p2 = scmp.eq.s32.totalorder %s1664_s16, 1 }
  0x11   : > { %p113_p3 = scmp.eq.s32.totalorder %s1248_s17, 1  ;;  %p1673_p4 = por %p84_p1, %p83_p0 }
  0x12   : > { %p1249_p5 = scmp.ge.s32.totalorder %s1605_s15, 1  ;;  %p120_p7 = scmp.lt.s32.totalorder %s1605_s15, 3 }
  0x13   : > { %p1678_p6 = por %p113_p3, %p83_p0  ;;  %s2975_s0 = sld [smem:[#allocation46_spill]] }
  0x14   : > { %p1686_p8 = pnand %p1249_p5, %p120_p7  ;;  %s2977_s1 = sld [smem:[#allocation47_spill]] }
  0x15   : > { %s2973_s19 = scalar_select %p1678_p6, 1, 0 }
  0x16   : > { %p1379_p10 = pneg %p1686_p8  ;;  %s1607_s27 = smov [#allocation6]  }
  0x17   : > { %2974 = sst [smem:[#allocation19_spill]] %s2973_s19  ;;  %s143_s28 = sshll.u32 %s1607_s27, 4  ;;  %s144_s28 = int_to_ptr.vmem [resolvable:$true] %s143_s28 }
  0x18   : > { %p1380_p11 = pnand %p1379_p10, %p84_p1  ;;  %s1608_s29 = smov [#allocation2]  }
  0x19   : > { %s132_s22 = sshll.u32 %s2975_s0, 4  ;;  %s1609_s30 = smov 256   ;;  %s133_s22 = int_to_ptr.hbm [resolvable:$true] %s132_s22 }
  0x1a   : > { %s141_s26 = sshll.u32 %s2977_s1, 4  ;;  %s1610_s4 = smov 16   ;;  %s142_s26 = int_to_ptr.hbm [resolvable:$true] %s141_s26 }
  0x1b   : > { %1382 = dma.hbm_to_smem (!%p1380_p11), %s133_s22, 16, %s1608_s29, [#allocation5]  }
  0x1c   : > { %1385 = dma.hbm_to_vmem [thread:$0]  (!%p1380_p11), %s142_s26, 512, %s144_s28, [#allocation3], %s1609_s30, %s1609_s30, %s1610_s4  }
  0x1d   : > { %s1699_s5 = sadd.s32 1, %s1605_s15   ;;  %s70_s7 = sadd.s32 1, %s1601_s14 }
  0x1e   : > { %2978 = sst [smem:[#allocation20_spill]] %s1699_s5  ;;  %s67_s6 = ssub.s32 %s1605_s15, %s1699_s5 }
  0x1f   : > { %p68_p12 = scmp.eq.s32.totalorder %s67_s6, 0  ;;  %p77_p13 = scmp.ne.s32.totalorder %s1601_s14, %s1597_s13 }
  0x20   : > { %p78_p0 = scmp.eq.s32.totalorder %s1605_s15, 0  ;;  %p1396_p7 = scmp.lt.s32.totalorder %s1605_s15, 2 }
  0x21   : > { %s1708_s8 = scalar_select %p68_p12, %s1601_s14, %s70_s7  }
  0x22   : > { %p79_p3 = por %p78_p0, %p77_p13  ;;  %p1712_p5 = por %p107_p2, %p77_p13 }
  0x23   : > { %2979 = sst [smem:[#allocation21_spill]] %s1708_s8  ;;  %s157_s10 = sand.u32 1, %s1601_s14  }
  0x24   : > { %s2980_s9 = scalar_select %p1712_p5, 1, 0 }
  0x25   : > { %s1253_s11 = sshll.u32 %s157_s10, 3  ;;  %s1365_s17 = sshll.u32 %s1605_s15, 3 }
  0x26   : > { %2981 = sst [smem:[#allocation22_spill]] %s2980_s9  ;;  %s161_s24 = scalar_lea.vmem [#allocation7], %s1253_s11 }
  0x27   : > { %s2982_s2 = sld [smem:[#allocation48_spill]]  ;;  %s170_s25 = sshll.u32 %s161_s24, 4  ;;  %s171_s25 = int_to_ptr.vmem [resolvable:$true] %s170_s25 }
  0x28   : > { %p1722_p10 = pnand %p1396_p7, %p79_p3  ;;  %s158_s28 = scalar_lea.sflag [#allocation8], %s157_s10 }
  0x2a   : > { %p1505_p11 = pneg %p1722_p10 }
  0x2d   : > { %s166_s22 = scalar_lea.hbm %s2982_s2, %s1365_s17  ;;  %s1508_s7 = scalar_lea.hbm %s2982_s2, 16 }
  0x2e   : > { %s168_s26 = sshll.u32 %s166_s22, 4  ;;  %s169_s26 = int_to_ptr.hbm [resolvable:$true] %s168_s26 }
  0x2f   : > { %s1501_s29 = sshra.s32 %s169_s26, 4  ;;  %s1502_s29 = int_to_ptr.hbm [resolvable:$true] %s1501_s29 }
  0x30   : > { %s1503_s30 = scalar_lea.hbm %s1502_s29, 8  ;;  %p1509_p0 = scmp.lt.s32.totalorder %s1502_s29, %s2982_s2 }
  0x31   : > { %p1504_p2 = scmp.ne.s32.totalorder %s1502_s29, %s1503_s30  ;;  %p1510_p3 = scmp.lt.s32.totalorder %s1508_s7, %s1503_s30 }
  0x33   : > { %p1506_p12 = pnand %p1505_p11, %p1504_p2  ;;  %p1511_p7 = por %p1510_p3, %p1509_p0 }
  0x35   : > { %p1507_p13 = pneg %p1506_p12 }
  0x37   : > { %p1512_p9 = pnand %p1511_p7, %p1507_p13 }
  0x39   : > { %1515 = shalt.err (!%p1512_p9)
}
  0x3a   : > { %1389 = dma.hbm_to_vmem [thread:$0]  (!%p1722_p10), %s169_s26, 128, %s171_s25, %s158_s28  }
  0x3b   : > { %179 = sbr.rel (%p1686_p8) target bundleno = 510 (0x1fe), region = 32 }
  0x40   : > { %1576 = dma.done.wait (%p84_p1), [#allocation5], 16  }
  0x41   : > { %1578 = vsyncadd (%p84_p1), [#allocation5], 4294967280 }
  0x42   : > { %1580 = dma.done.wait (%p84_p1), [#allocation3], 512  }
  0x43   : > { %1582 = vsyncadd (%p84_p1), [#allocation3], 4294966784  ;;  %s1747_s10 = sand.u32 1, %s1597_s13  }
  0x44   : > { %2984 = sst [smem:[#allocation23_spill]] %s1747_s10  ;;  %s2890_s23 = sshll.u32 %s1747_s10, 3 }
  0x45   : > { %s192_s20 = scalar_lea.sflag [#allocation8], %s1747_s10  ;;  %s195_s21 = scalar_lea.vmem [#allocation7], %s2890_s23 }
  0x46   : > { %1584 = dma.done.wait (%p1673_p4), %s192_s20, 128  }
  0x47   : > { %1586 = vsyncadd (%p1673_p4), %s192_s20, 4294967168 }
  0x48   : > { %201 = sfence }
  0x49   : > { %v1757_v0 = vld [vmem:[%s195_s21] sm:$0xff]  ;;  %vm227_vm0 = vcmask 1043456   ;;  %s1611_s18 = smov 3   ;;  %s1612_s22 = smov 127   ;;  %v366_v36 = vlaneseq }
  0x4a   : > { %2985 = vst [vmem:[#allocation24_spill] sm:$0xff] %v1757_v0  ;;  %s1613_s24 = smov 2   ;;  %s1614_s25 = smov 1   ;;  %v1835_v38 = vld [vmem:[#allocation6 + $0x1] ss:$8 sm:$0x3] }
  0x4b   : > { %222 = vst [vmem:[#allocation1] ss:$2 sm:$0xff] %v1757_v0  ;;  %s1615_s26 = smov 126   ;;  %s1616_s27 = smov 125   ;;  %v1827_v37 = vand.u32 127, %v366_v36  ;;  %v2912_v40 = vperm.slane %v1835_v38, 1 }
  0x4c   : > { %s1797_s28 = sld [smem:[#allocation2 + $0x1]]  ;;  %v1845_v41 = vld [vmem:[#allocation6] ss:$8 sm:$0x3]  ;;  %v2913_v42 = vperm.slane %v1835_v38, 0 }
  0x4d   : > { %s1799_s29 = sld [smem:[#allocation2 + $0x8]]  ;;  %vm448_vm1 = vcmp.lt.s32.totalorder %v1827_v37, 2  ;;  %v372_v45 = vperm.slane %v1845_v41, 0  ;;  %vm368_vm2 = vcmp.lt.s32.totalorder %v1827_v37, 3  ;;  %v373_v50 = vperm.slane %v1845_v41, 1 }
  0x4e   : > { %s1801_s30 = sld [smem:[#allocation2 + $0xf]]  ;;  %v1866_v47 = vld [vmem:[#allocation6 + $0x2] ss:$8 sm:$0x3]  ;;  %vm542_vm3 = vcmp.lt.s32.totalorder %v1827_v37, 1  ;;  %vm706_vm4 = vcmp.lt.s32.totalorder %v1827_v37, 127 }
  0x4f   : > { %s1803_s4 = sld [smem:[#allocation2]]  ;;  %v1868_v48 = vld [vmem:[#allocation6 + $0x4] ss:$8 sm:$0x3]  ;;  %v2921_v59 = vperm.slane %v1866_v47, 0  ;;  %v2918_v60 = vperm.slane %v1866_v47, 1 }
  0x50   : > { %s1805_s6 = sld [smem:[#allocation2 + $0x7]]  ;;  %v2926_v61 = vperm.slane %v1868_v48, 0  ;;  %v2925_v62 = vperm.slane %v1868_v48, 1  ;;  %v1960_v36 = vld [vmem:[#allocation6 + $0x5] ss:$8 sm:$0x3] }
  0x51   : > { %s1807_s7 = sld [smem:[#allocation2 + $0xe]]  ;;  %vm800_vm5 = vcmp.lt.s32.totalorder %v1827_v37, 126  ;;  %vm894_vm6 = vcmp.lt.s32.totalorder %v1827_v37, 125  ;;  %vm1004_vm7 = vcmp.lt.s32.totalorder %v1827_v37, 32  ;;  %vm988_vm8 = vcmp.lt.s32.totalorder %v1827_v37, 48 }
  0x52   : > { %v223_v1 = vld.sshfl [vmem:[#allocation1] sm:$0xff pattern:$0x75316420]  ;;  %v224_v2 = vld.sshfl [vmem:[#allocation1 + $0x8] sm:$0xff pattern:$0x75316420]  ;;  %v466_v51 = vstv %s1797_s28 }
  0x53   : > { %v228_v3 = vsel %vm227_vm0, %v223_v1, -inf  ;;  %v235_v4 = vsel %vm227_vm0, %v224_v2, -inf  ;;  %242 = vst [vmem:[#allocation1] ss:$2 sm:$0xff] %v1757_v0  ;;  %s1809_s11 = sld [smem:[#allocation2 + $0x2]]  ;;  %v476_v52 = vstv %s1799_s29  ;;  %vm1022_vm9 = vcmp.lt.s32.totalorder %v1827_v37, 16 }
  0x54   : > { %v229_v5 = vrot.slane %v228_v3, 4  ;;  %v236_v6 = vrot.slane %v235_v4, 4  ;;  %s1811_s17 = sld [smem:[#allocation2 + $0x31]]  ;;  %v486_v58 = vstv %s1801_s30  ;;  %vm1042_vm10 = vcmp.lt.s32.totalorder %v1827_v37, 112 }
  0x55   : > { %s1813_s20 = sld [smem:[#allocation2 + $0x9]]  ;;  %v386_v55 = vstv %s1803_s4  ;;  %vm1078_vm11 = vcmp.lt.s32.totalorder %v1827_v37, 80  ;;  %vm1060_vm12 = vcmp.lt.s32.totalorder %v1827_v37, 96 }
  0x56   : > { %v230_v7 = vmax.f32 %v228_v3, %v229_v5  ;;  %v237_v8 = vmax.f32 %v235_v4, %v236_v6  ;;  %s1815_s21 = sld [smem:[#allocation2 + $0x38]]  ;;  %v394_v56 = vstv %s1805_s6 }
  0x57   : > { %s1831_s23 = sld [smem:[#allocation2 + $0x1c]]  ;;  %v402_v57 = vstv %s1807_s7 }
  0x58   : > { %v231_v9 = vrot.slane %v230_v7, 2  ;;  %v238_v10 = vrot.slane %v237_v8, 2  ;;  %s1833_s0 = sld [smem:[#allocation2 + $0x32]] }
  0x59   : > { %s1837_s1 = sld [smem:[#allocation2 + $0x39]]  ;;  %v560_v2 = vstv %s1809_s11 }
  0x5a   : > { %v232_v11 = vmax.f32 %v230_v7, %v231_v9  ;;  %v239_v12 = vmax.f32 %v237_v8, %v238_v10  ;;  %v243_v13 = vld.sshfl [vmem:[#allocation1] sm:$0xff pattern:$0x75316420]  ;;  %v244_v14 = vld.sshfl [vmem:[#allocation1 + $0x8] sm:$0xff pattern:$0x75316420]  ;;  %v389_v63 = vstv %s1811_s17 }
  0x5b   : > { %v247_v15 = vsel %vm227_vm0, %v243_v13, 0.0  ;;  %v254_v16 = vsel %vm227_vm0, %v244_v14, 0.0  ;;  %s1840_s2 = sld [smem:[#allocation2 + $0x33]]  ;;  %v570_v6 = vstv %s1813_s20 }
  0x5c   : > { %v233_v17 = vrot.slane %v232_v11, 1  ;;  %v240_v18 = vrot.slane %v239_v12, 1  ;;  %v248_v19 = vrot.slane %v247_v15, 4  ;;  %v255_v20 = vrot.slane %v254_v16, 4  ;;  %s1842_s8 = sld [smem:[#allocation2 + $0x3a]] }
  0x5d   : > { %2989 = sst [smem:[#allocation28_spill]] %s1831_s23  ;;  %v397_v4 = vstv %s1815_s21 }
  0x5e   : > { %v1765_v21 = vmax.f32 %v232_v11, %v233_v17  ;;  %v1767_v22 = vmax.f32 %v239_v12, %v240_v18  ;;  %v249_v23 = vadd.f32 %v248_v19, %v247_v15  ;;  %v256_v24 = vadd.f32 %v255_v20, %v254_v16  ;;  %s1847_s14 = sld [smem:[#allocation2 + $0x3]] }
  0x5f   : > { %s1852_s13 = sld [smem:[#allocation2 + $0x34]]  ;;  %v2916_v19 = vstv %s1831_s23 }
  0x60   : > { %2986 = vst [vmem:[#allocation25_spill] sm:$0xff] %v1765_v21  ;;  %362 = vrot.lane.b32.xlu0 %v1765_v21, %s1611_s18  ;;  %704 = vrot.lane.b32.xlu1 %v1767_v22, %s1612_s22  ;;  %v250_v25 = vrot.slane %v249_v23, 2  ;;  %v257_v26 = vrot.slane %v256_v24, 2  ;;  %s1856_s5 = sld [smem:[#allocation2 + $0xa]] }
  0x61   : > { %444 = vrot.lane.b32.xlu2 %v1765_v21, %s1613_s24  ;;  %s1859_s15 = sld [smem:[#allocation2 + $0x24]] }
  0x62   : > { %v251_v27 = vadd.f32 %v250_v25, %v249_v23  ;;  %v258_v28 = vadd.f32 %v257_v26, %v256_v24  ;;  %s1876_s19 = sld [smem:[#allocation2 + $0x3b]] }
  0x63   : > { %s1881_s12 = sld [smem:[#allocation2 + $0x35]] }
  0x64   : > { %v252_v29 = vrot.slane %v251_v27, 1  ;;  %v259_v31 = vrot.slane %v258_v28, 1  ;;  %s1891_s28 = sld [smem:[#allocation2 + $0x40]]  ;;  %v630_v23 = vstv %s1847_s14 }
  0x65   : > { %s1898_s29 = sld [smem:[#allocation2 + $0x3c]]  ;;  %v633_v24 = vstv %s1852_s13 }
  0x66   : > { %v253_v30 = vadd.f32 %v252_v29, %v251_v27  ;;  %v260_v33 = vadd.f32 %v259_v31, %v258_v28  ;;  %s1901_s30 = sld [smem:[#allocation2 + $0x5]]  ;;  %v2915_v25 = vstv %s1856_s5  ;;  %v632_v28 = vmul.f32 %v630_v23, %v1767_v22 }
  0x67   : > { %2990 = sst [smem:[#allocation29_spill]] %s1859_s15  ;;  %v2908_v20 = vstv %s1859_s15 }
  0x68   : > { %364 = vrot.lane.b32.xlu0 %v1767_v22, %s1611_s18  ;;  %v1773_v32 = vmul.f32 0.25, %v253_v30  ;;  %v1777_v34 = vmul.f32 0.25, %v260_v33  ;;  %s1911_s9 = sld [smem:[#allocation2 + $0xc]]  ;;  %v2914_v26 = vstv %s1876_s19  ;;  %v641_v30 = vmul.f32 %v2915_v25, %v1765_v21 }
  0x69   : > { %446 = vrot.lane.b32.xlu2 %v1767_v22, %s1613_s24  ;;  %2993 = sst [smem:[#allocation32_spill]] %s1881_s12 }
  0x6a   : > { %2987 = vst [vmem:[#allocation26_spill] sm:$0xff] %v1773_v32  ;;  %378 = vrot.lane.b32.xlu1 %v1773_v32, %s1611_s18  ;;  %2994 = sst [smem:[#allocation33_spill]] %s1891_s28  ;;  %v635_v29 = vmul.f32 %v633_v24, %v1777_v34  ;;  %v644_v31 = vmul.f32 %v2914_v26, %v1773_v32 }
  0x6b   : > { %s1923_s3 = sld [smem:[#allocation2 + $0x11]] }
  0x6c   : > { %s1935_s10 = sld [smem:[#allocation2 + $0x42]] }
  0x6d   : > { %s1944_s16 = sld [smem:[#allocation2 + $0x41]] }
  0x6e   : > { %s1964_s13 = sld [smem:[#allocation2 + $0x4d]] }
  0x6f   : > { %s1979_s14 = sld [smem:[#allocation2 + $0x43]] }
  0x70   : > { %540 = vrot.lane.b32.xlu0 %v1767_v22, %s1614_s25  ;;  %s1992_s28 = sld [smem:[#allocation2 + $0x36]] }
  0x71   : > { %538 = vrot.lane.b32.xlu2 %v1765_v21, %s1614_s25  ;;  %s2006_s15 = sld [smem:[#allocation2 + $0x3d]] }
  0x72   : > { %380 = vrot.lane.b32.xlu1 %v1777_v34, %s1611_s18  ;;  %s1817_s18 = sld [smem:[#allocation2 + $0x10]] }
  0x73   : > { %s2012_s12 = sld [smem:[#allocation2 + $0x13]] }
  0x74   : > { %s2023_s4 = sld [smem:[#allocation2 + $0x44]]  ;;  %v2924_v25 = vstv %s1964_s13 }
  0x75   : > { %s2067_s6 = sld [smem:[#allocation2 + $0xd]] }
  0x76   : > { %2999 = sst [smem:[#allocation38_spill]] %s1992_s28 }
  0x77   : > { %s2081_s7 = sld [smem:[#allocation2 + $0x37]] }
  0x78   : > { %702 = vrot.lane.b32.xlu0 %v1765_v21, %s1612_s22  ;;  %v580_v10 = vstv %s1817_s18  ;;  %s2102_s23 = sld [smem:[#allocation2 + $0x3e]] }
  0x79   : > { %554 = vrot.lane.b32.xlu2 %v1777_v34, %s1614_s25  ;;  %s2125_s28 = sld [smem:[#allocation2 + $0x4e]] }
  0x7a   : > { %460 = vrot.lane.b32.xlu1 %v1777_v34, %s1613_s24  ;;  %s2136_s11 = sld [smem:[#allocation2 + $0x54]] }
  0x7b   : > { %s2144_s17 = sld [smem:[#allocation2 + $0x14]] }
  0x7c   : > { %s2167_s18 = sld [smem:[#allocation2 + $0x25]] }
  0x7d   : > { %s2200_s20 = sld [smem:[#allocation2 + $0x45]] }
  0x7e   : > { %s2496_s21 = sld [smem:[#allocation2 + $0x52]] }
  0x80   : > { %458 = vrot.lane.b32.xlu0 %v1773_v32, %s1613_s24  ;;  %s1821_s24 = sld [smem:[#allocation2 + $0x4]] }
  0x81   : > { %716 = vrot.lane.b32.xlu2 %v1773_v32, %s1612_s22 }
  0x82   : > { %552 = vrot.lane.b32.xlu1 %v1773_v32, %s1614_s25  ;;  %s1823_s25 = sld [smem:[#allocation2 + $0xb]] }
  0x88   : > { %718 = vrot.lane.b32.xlu0 %v1777_v34, %s1612_s22  ;;  %s1819_s22 = sld [smem:[#allocation2 + $0x3f]] }
  0x89   : > { %798 = vrot.lane.b32.xlu2 %v1767_v22, %s1615_s26 }
  0x8a   : > { %796 = vrot.lane.b32.xlu1 %v1765_v21, %s1615_s26 }
  0x8e   : > { %v405_v8 = vstv %s1819_s22  ;;  %s2181_s22 = sld [smem:[#allocation2 + $0x55]] }
  0x90   : > { %810 = vrot.lane.b32.xlu0 %v1773_v32, %s1615_s26 }
  0x91   : > { %890 = vrot.lane.b32.xlu2 %v1765_v21, %s1616_s27 }
  0x92   : > { %812 = vrot.lane.b32.xlu1 %v1777_v34, %s1615_s26  ;;  %s1825_s26 = sld [smem:[#allocation2 + $0x12]] }
  0x98   : > { %892 = vrot.lane.b32.xlu0 %v1767_v22, %s1616_s27 }
  0x99   : > { %906 = vrot.lane.b32.xlu2 %v1777_v34, %s1616_s27 }
  0x9a   : > { %904 = vrot.lane.b32.xlu1 %v1773_v32, %s1616_s27  ;;  %s1829_s27 = sld [smem:[#allocation2 + $0x1d]] }
  0xa0   : > { %2988 = sst [smem:[#allocation27_spill]] %s1829_s27  ;;  %v2905_v3 = vstv %s1829_s27 }
  0xa1   : > { %s1954_s27 = sld [smem:[#allocation2 + $0x23]] }
  0xa7   : > { %2995 = sst [smem:[#allocation34_spill]] %s1954_s27 }
  0xbb   : > { %v445_v35 = vpop.permute.xlu2 %444 }
  0xc3   : > { %v447_v39 = vpop.permute.xlu2 %446 }
  0xc4   : > { %v449_v43 = vsel %vm448_vm1, %v445_v35, %v447_v39  ;;  %v450_v44 = vsel %vm448_vm1, %v447_v39, %v445_v35  ;;  %v1987_v39 = vadd.f32 %v635_v29, %v632_v28 }
  0xc5   : > { %v1863_v46 = vmul.f32 %v2912_v40, %v449_v43  ;;  %v1872_v49 = vmul.f32 %v2913_v42, %v450_v44 }
  0xc7   : > { %2991 = vst [vmem:[#allocation30_spill] sm:$0xff] %v1863_v46  ;;  %v1895_v1 = vmul.f32 %v466_v51, %v1863_v46  ;;  %v1905_v5 = vmul.f32 %v476_v52, %v1872_v49  ;;  %v1909_v7 = vmul.f32 %v466_v51, %v1872_v49  ;;  %v1915_v9 = vmul.f32 %v486_v58, %v1872_v49 }
  0xc8   : > { %2992 = vst [vmem:[#allocation31_spill] sm:$0xff] %v1872_v49  ;;  %v1919_v11 = vmul.f32 %v486_v58, %v1863_v46  ;;  %v1926_v14 = vmul.f32 %v476_v52, %v1863_v46  ;;  %v1931_v15 = vmul.f32 %v2905_v3, %v1863_v46  ;;  %v634_v58 = vmul.f32 %v633_v24, %v1773_v32 }
  0xc9   : > { %v1990_v24 = vadd.f32 %v644_v31, %v641_v30  ;;  %v650_v30 = vstv %s1923_s3  ;;  %v653_v31 = vstv %s1935_s10  ;;  %s2038_s3 = sld [smem:[#allocation2 + $0x1e]]  ;;  %v3012_v46 = vstv %s1876_s19 }
  0xca   : > { %v654_v3 = vmul.f32 %v653_v31, %v1773_v32  ;;  %s2054_s10 = sld [smem:[#allocation2 + $0x6]] }
  0xcb   : > { %v539_v16 = vpop.permute.xlu2 %538  ;;  %s3015_s19 = sld [smem:[#allocation33_spill]] }
  0xd2   : > { %v363_v53 = vpop.permute.xlu0 %362  ;;  %v1879_v54 = vpop.permute.xlu1 %704 }
  0xd3   : > { %v2020_v17 = vpop.permute.xlu2 %554 }
  0xda   : > { %v365_v27 = vpop.permute.xlu0 %364 }
  0xdb   : > { %v369_v33 = vsel %vm368_vm2, %v363_v53, %v365_v27  ;;  %v370_v35 = vsel %vm368_vm2, %v365_v27, %v363_v53  ;;  %v631_v53 = vmul.f32 %v630_v23, %v1765_v21  ;;  %v651_v23 = vmul.f32 %v650_v30, %v1765_v21 }
  0xdc   : > { %v1968_v44 = vmul.f32 %v372_v45, %v370_v35  ;;  %v1972_v51 = vmul.f32 %v373_v50, %v369_v33  ;;  %v379_v52 = vpop.permute.xlu1 %378  ;;  %v1984_v33 = vmul.f32 %v2908_v20, %v1872_v49  ;;  %v3026_v21 = vstv %s1842_s8 }
  0xdd   : > { %v2008_v29 = vadd.f32 %v634_v58, %v631_v53 }
  0xde   : > { %2996 = vst [vmem:[#allocation35_spill] sm:$0xff] %v1968_v44  ;;  %v388_v27 = vmul.f32 %v386_v55, %v1972_v51  ;;  %v395_v43 = vmul.f32 %v394_v56, %v1968_v44  ;;  %v387_v35 = vmul.f32 %v386_v55, %v1968_v44  ;;  %v403_v20 = vmul.f32 %v402_v57, %v1968_v44 }
  0xdf   : > { %2997 = vst [vmem:[#allocation36_spill] sm:$0xff] %v1972_v51  ;;  %v404_v58 = vmul.f32 %v402_v57, %v1972_v51  ;;  %v2031_v40 = vmul.f32 %v394_v56, %v1972_v51  ;;  %v2917_v55 = vstv %s1954_s27  ;;  %v2043_v53 = vmul.f32 %v2916_v19, %v1972_v51  ;;  %s2097_s27 = sld [smem:[#allocation2 + $0x20]] }
  0xe0   : > { %2998 = vst [vmem:[#allocation37_spill] sm:$0xff] %v1984_v33 }
  0xe2   : > { %v541_v28 = vpop.permute.xlu0 %540 }
  0xe3   : > { %v543_v42 = vsel %vm542_vm3, %v539_v16, %v541_v28  ;;  %v544_v26 = vsel %vm542_vm3, %v541_v28, %v539_v16  ;;  %v2056_v16 = vadd.f32 %v654_v3, %v651_v23  ;;  %v2061_v28 = vmul.f32 %v2917_v55, %v1968_v44 }
  0xe4   : > { %v381_v57 = vpop.permute.xlu1 %380  ;;  %v2048_v56 = vmul.f32 %v2921_v59, %v544_v26  ;;  %v2052_v18 = vmul.f32 %v2918_v60, %v543_v42  ;;  %v652_v3 = vmul.f32 %v650_v30, %v1767_v22  ;;  %v2079_v60 = vld [vmem:[#allocation6 + $0x6] ss:$8 sm:$0x3]  ;;  %v655_v30 = vmul.f32 %v653_v31, %v1777_v34 }
  0xe5   : > { %v382_v19 = vsel %vm368_vm2, %v379_v52, %v381_v57  ;;  %v383_v26 = vsel %vm368_vm2, %v381_v57, %v379_v52 }
  0xe6   : > { %3000 = vst [vmem:[#allocation39_spill] sm:$0xff] %v2048_v56  ;;  %v2073_v23 = vmul.f32 %v383_v26, %v372_v45  ;;  %v2077_v55 = vmul.f32 %v382_v19, %v373_v50  ;;  %v2086_v52 = vmul.f32 %v560_v2, %v2052_v18  ;;  %v2095_v50 = vmul.f32 %v570_v6, %v2048_v56 }
  0xe7   : > { %3001 = vst [vmem:[#allocation40_spill] sm:$0xff] %v2052_v18  ;;  %v2114_v45 = vmul.f32 %v560_v2, %v2048_v56  ;;  %v2122_v42 = vmul.f32 %v580_v10, %v2048_v56 }
  0xe8   : > { %3002 = vst [vmem:[#allocation41_spill] sm:$0xff] %v2073_v23  ;;  %v391_v19 = vmul.f32 %v389_v63, %v2077_v55  ;;  %v398_v31 = vmul.f32 %v397_v4, %v2073_v23  ;;  %v390_v41 = vmul.f32 %v389_v63, %v2073_v23  ;;  %v406_v57 = vmul.f32 %v405_v8, %v2073_v23 }
  0xe9   : > { %3003 = vst [vmem:[#allocation42_spill] sm:$0xff] %v2077_v55  ;;  %v407_v2 = vmul.f32 %v405_v8, %v2077_v55  ;;  %v2151_v8 = vmul.f32 %v580_v10, %v2052_v18  ;;  %v2165_v10 = vadd.f32 %v655_v30, %v652_v3  ;;  %v3006_v3 = vstv %s1821_s24  ;;  %s2505_s24 = sld [smem:[#allocation2 + $0x26]] }
  0xea   : > { %v703_v13 = vpop.permute.xlu0 %702  ;;  %v2127_v26 = vadd.f32 %v391_v19, %v388_v27  ;;  %v2129_v12 = vadd.f32 %v398_v31, %v395_v43  ;;  %v2131_v63 = vadd.f32 %v390_v41, %v387_v35  ;;  %v2146_v27 = vadd.f32 %v406_v57, %v403_v20  ;;  %v2161_v41 = vpop.permute.xlu2 %716 }
  0xeb   : > { %v707_v59 = vsel %vm706_vm4, %v703_v13, %v1879_v54  ;;  %v708_v43 = vsel %vm706_vm4, %v1879_v54, %v703_v13  ;;  %v2163_v20 = vadd.f32 %v407_v2, %v404_v58  ;;  %v399_v57 = vmul.f32 %v397_v4, %v2077_v55 }
  0xec   : > { %v2155_v35 = vmul.f32 %v2926_v61, %v707_v59  ;;  %v2159_v54 = vmul.f32 %v2925_v62, %v708_v43  ;;  %v461_v13 = vpop.permute.xlu1 %460  ;;  %v2176_v19 = vmul.f32 %v570_v6, %v2052_v18  ;;  %v423_v58 = vmul.f32 %v2924_v25, %v2077_v55 }
  0xed   : > { %v3007_v4 = vstv %s1823_s25  ;;  %v3008_v6 = vmov %v3006_v3  ;;  %v3009_v25 = vstv %s1825_s26  ;;  %v2215_v43 = vadd.f32 %v399_v57, %v2031_v40  ;;  %s2507_s25 = sld [smem:[#allocation2 + $0x22]] }
  0xee   : > { %3004 = vst [vmem:[#allocation43_spill] sm:$0xff] %v2155_v35  ;;  %v2186_v30 = vmul.f32 %v3006_v3, %v2159_v54  ;;  %v2192_v2 = vmul.f32 %v3007_v4, %v2155_v35  ;;  %v2198_v59 = vmul.f32 %v3008_v6, %v2155_v35  ;;  %v2205_v62 = vmul.f32 %v3009_v25, %v2155_v35  ;;  %s2518_s26 = sld [smem:[#allocation2 + $0x53]] }
  0xef   : > { %3005 = vst [vmem:[#allocation44_spill] sm:$0xff] %v2159_v54  ;;  %v3010_v31 = vmov %v3009_v25  ;;  %v3011_v6 = vstv %s1856_s5  ;;  %v645_v55 = vmul.f32 %v3012_v46, %v1777_v34  ;;  %v3013_v25 = vmov %v3007_v4  ;;  %s2471_s5 = sld [smem:[#allocation2 + $0x50]] }
  0xf0   : > { %v2211_v61 = vmul.f32 %v3010_v31, %v2159_v54  ;;  %v642_v0 = vmul.f32 %v3011_v6, %v1767_v22  ;;  %v2226_v51 = vmul.f32 %v3013_v25, %v2159_v54  ;;  %v2229_v3 = vadd.f32 %v423_v58, %v2043_v53 }
  0xf1   : > { %v2934_v4 = vstv %s2038_s3  ;;  %v2939_v6 = vstv %s2097_s27  ;;  %v2942_v25 = vstv %s2136_s11 }
  0xf2   : > { %v459_v40 = vpop.permute.xlu0 %458  ;;  %v2234_v57 = vadd.f32 %v645_v55, %v642_v0  ;;  %v2239_v46 = vmul.f32 %v2934_v4, %v2052_v18  ;;  %v2250_v31 = vmul.f32 %v2939_v6, %v2159_v54  ;;  %v430_v0 = vmul.f32 %v2942_v25, %v2073_v23 }
  0xf3   : > { %v462_v53 = vsel %vm448_vm1, %v459_v40, %v461_v13  ;;  %v463_v58 = vsel %vm448_vm1, %v461_v13, %v459_v40  ;;  %v3014_v55 = vperm.slane %v1835_v38, 0  ;;  %v3016_v18 = vperm.slane %v1835_v38, 1  ;;  %v799_v40 = vpop.permute.xlu2 %798 }
  0xf4   : > { %v553_v13 = vpop.permute.xlu1 %552  ;;  %v3019_v25 = vperm.slane %v1866_v47, 1  ;;  %v3020_v23 = vstv %s1833_s0  ;;  %v3023_v38 = vstv %s3015_s19  ;;  %s3029_s0 = sld [smem:[#allocation32_spill]] }
  0xf5   : > { %v2257_v4 = vmul.f32 %v463_v58, %v3014_v55  ;;  %v2261_v49 = vmul.f32 %v462_v53, %v3016_v18  ;;  %v556_v54 = vsel %vm542_vm3, %v553_v13, %v2020_v17  ;;  %v557_v58 = vsel %vm542_vm3, %v2020_v17, %v553_v13  ;;  %s3085_s19 = sld [smem:[#allocation28_spill]] }
  0xf6   : > { %v2272_v55 = vadd.f32 %v430_v0, %v2061_v28  ;;  %v3018_v18 = vperm.slane %v1866_v47, 0  ;;  %v2281_v6 = vmul.f32 %v556_v54, %v3019_v25  ;;  %v3021_v17 = vstv %s1837_s1 }
  0xf7   : > { %v471_v44 = vmul.f32 %v3020_v23, %v2261_v49  ;;  %v480_v13 = vmul.f32 %v3021_v17, %v2257_v4  ;;  %v3022_v28 = vmov %v3020_v23  ;;  %v490_v35 = vmul.f32 %v3023_v38, %v2257_v4 }
  0xf8   : > { %3017 = vst [vmem:[#allocation45_spill] sm:$0xff] %v2272_v55  ;;  %v2277_v53 = vmul.f32 %v557_v58, %v3018_v18  ;;  %v470_v0 = vmul.f32 %v3022_v28, %v2257_v4  ;;  %v3024_v18 = vmov %v3023_v38  ;;  %v3025_v25 = vstv %s1840_s2  ;;  %s3043_s2 = sld [smem:[#allocation38_spill]] }
  0xf9   : > { %v491_v47 = vmul.f32 %v3024_v18, %v2261_v49  ;;  %v473_v54 = vadd.f32 %v471_v44, %v1895_v1  ;;  %v565_v32 = vmul.f32 %v3025_v25, %v2281_v6  ;;  %v482_v23 = vadd.f32 %v480_v13, %v1905_v5 }
  0xfa   : > { %v574_v17 = vmul.f32 %v3026_v21, %v2277_v53  ;;  %v472_v55 = vadd.f32 %v470_v0, %v1909_v7  ;;  %v3027_v28 = vmov %v3025_v25  ;;  %v492_v38 = vadd.f32 %v490_v35, %v1915_v9  ;;  %v719_v33 = vpop.permute.xlu0 %718 }
  0xfb   : > { %v564_v56 = vmul.f32 %v3027_v28, %v2277_v53  ;;  %v3028_v58 = vstv %s1944_s16  ;;  %v475_v1 = vadd.f32 %v473_v54, %v2127_v26  ;;  %v567_v44 = vadd.f32 %v565_v32, %v2086_v52 }
  0xfc   : > { %v584_v18 = vmul.f32 %v3028_v58, %v2277_v53  ;;  %v484_v5 = vadd.f32 %v482_v23, %v2129_v12  ;;  %v576_v13 = vadd.f32 %v574_v17, %v2095_v50  ;;  %v720_v21 = vsel %vm706_vm4, %v2161_v41, %v719_v33  ;;  %v797_v35 = vpop.permute.xlu1 %796 }
  0xfd   : > { %v721_v7 = vsel %vm706_vm4, %v719_v33, %v2161_v41  ;;  %v474_v9 = vadd.f32 %v472_v55, %v2131_v63  ;;  %v566_v26 = vadd.f32 %v564_v56, %v2114_v45  ;;  %v3030_v32 = vperm.slane %v1868_v48, 0 }
  0xfe   : > { %v3031_v12 = vperm.slane %v1868_v48, 1  ;;  %v569_v0 = vadd.f32 %v567_v44, %v475_v1  ;;  %v578_v58 = vadd.f32 %v576_v13, %v484_v5  ;;  %v801_v33 = vsel %vm800_vm5, %v797_v35, %v799_v40  ;;  %v891_v5 = vpop.permute.xlu2 %890 }
  0xff   : > { %v2329_v52 = vmul.f32 %v720_v21, %v3030_v32  ;;  %v802_v56 = vsel %vm800_vm5, %v799_v40, %v797_v35  ;;  %v568_v45 = vadd.f32 %v566_v26, %v474_v9  ;;  %v494_v63 = vadd.f32 %v492_v38, %v2146_v27 }
 0x100   : > { %v2333_v50 = vmul.f32 %v721_v7, %v3031_v12  ;;  %v3032_v48 = vperm.slane %v1960_v36, 0  ;;  %v3033_v55 = vperm.slane %v1960_v36, 1  ;;  %v639_v25 = vadd.f32 %v1987_v39, %v569_v0 }
 0x101   : > { %v3034_v23 = vstv %s3029_s0  ;;  %v648_v40 = vadd.f32 %v1990_v24, %v578_v58  ;;  %v3035_v28 = vstv %s1898_s29  ;;  %v638_v38 = vadd.f32 %v2008_v29, %v568_v45  ;;  %s2605_s0 = sld [smem:[#allocation2 + $0x2a]] }
 0x102   : > { %v2342_v41 = vmul.f32 %v3032_v48, %v801_v33  ;;  %v2346_v54 = vmul.f32 %v3033_v55, %v802_v56  ;;  %v729_v17 = vmul.f32 %v3034_v23, %v2333_v50  ;;  %v738_v27 = vmul.f32 %v3035_v28, %v2329_v52  ;;  %v811_v0 = vpop.permute.xlu0 %810 }
 0x103   : > { %v3036_v1 = vmov %v3034_v23  ;;  %v3037_v13 = vstv %s1901_s30  ;;  %v3038_v24 = vstv %s1911_s9  ;;  %v586_v12 = vadd.f32 %v584_v18, %v2122_v42  ;;  %s1618_s30 = smov 32  }
 0x104   : > { %v728_v44 = vmul.f32 %v3036_v1, %v2329_v52  ;;  %v731_v39 = vadd.f32 %v729_v17, %v2186_v30  ;;  %v820_v21 = vmul.f32 %v3037_v13, %v2346_v54  ;;  %v829_v7 = vmul.f32 %v3038_v24, %v2342_v41  ;;  %v813_v42 = vpop.permute.xlu1 %812 }
 0x105   : > { %v3039_v9 = vmov %v3037_v13  ;;  %v740_v29 = vadd.f32 %v738_v27, %v2192_v2  ;;  %v3040_v35 = vstv %s1979_s14  ;;  %v3041_v33 = vstv %s2012_s12  ;;  %s2449_s12 = sld [smem:[#allocation2 + $0x21]] }
 0x106   : > { %v819_v26 = vmul.f32 %v3039_v9, %v2342_v41  ;;  %v730_v32 = vadd.f32 %v728_v44, %v2198_v59  ;;  %v748_v30 = vmul.f32 %v3040_v35, %v2329_v52  ;;  %v733_v58 = vadd.f32 %v731_v39, %v639_v25  ;;  %s2531_s14 = sld [smem:[#allocation2 + $0x57]] }
 0x107   : > { %v839_v56 = vmul.f32 %v3041_v33, %v2342_v41  ;;  %v493_v45 = vadd.f32 %v491_v47, %v1919_v11  ;;  %v3042_v48 = vstv %s1944_s16  ;;  %v742_v55 = vadd.f32 %v740_v29, %v648_v40  ;;  %s2455_s16 = sld [smem:[#allocation2 + $0x4f]] }
 0x108   : > { %v585_v2 = vmul.f32 %v3042_v48, %v2281_v6  ;;  %v732_v23 = vadd.f32 %v730_v32, %v638_v38  ;;  %v588_v59 = vadd.f32 %v586_v12, %v494_v63  ;;  %v750_v17 = vadd.f32 %v748_v30, %v2205_v62 }
 0x109   : > { %v495_v18 = vadd.f32 %v493_v45, %v2163_v20  ;;  %v3044_v28 = vmov %v3040_v35  ;;  %v3045_v47 = vmov %v3041_v33  ;;  %v814_v62 = vsel %vm800_vm5, %v811_v0, %v813_v42 }
 0x10a   : > { %v587_v25 = vadd.f32 %v585_v2, %v2151_v8  ;;  %v749_v11 = vmul.f32 %v3044_v28, %v2333_v50  ;;  %v840_v40 = vmul.f32 %v3045_v47, %v2346_v54  ;;  %v815_v63 = vsel %vm800_vm5, %v813_v42, %v811_v0  ;;  %v907_v28 = vpop.permute.xlu2 %906 }
 0x10b   : > { %v658_v20 = vadd.f32 %v2056_v16, %v588_v59  ;;  %v3046_v8 = vstv %s1837_s1  ;;  %v3047_v38 = vperm.slane %v1960_v36, 0  ;;  %v3048_v44 = vperm.slane %v1960_v36, 1  ;;  %s2439_s1 = sld [smem:[#allocation2 + $0x1f]] }
 0x10c   : > { %v481_v27 = vmul.f32 %v3046_v8, %v2261_v49  ;;  %v589_v13 = vadd.f32 %v587_v25, %v495_v18  ;;  %v751_v24 = vadd.f32 %v749_v11, %v2211_v61  ;;  %v3049_v32 = vstv %s1842_s8  ;;  %v893_v25 = vpop.permute.xlu0 %892  ;;  %s2482_s8 = sld [smem:[#allocation2 + $0x51]] }
 0x10d   : > { %v2403_v1 = vmul.f32 %v814_v62, %v3047_v38  ;;  %v2407_v39 = vmul.f32 %v815_v63, %v3048_v44  ;;  %v752_v9 = vadd.f32 %v750_v17, %v658_v20  ;;  %v575_v16 = vmul.f32 %v3049_v32, %v2281_v6 }
 0x10e   : > { %v483_v29 = vadd.f32 %v481_v27, %v1926_v14  ;;  %v3050_v12 = vstv %s1898_s29  ;;  %v3051_v30 = vstv %s3043_s2  ;;  %v3052_v33 = vstv %s2006_s15  ;;  %s1617_s29 = smov 48   ;;  %s2612_s2 = sld [smem:[#allocation2 + $0x2c]] }
 0x10f   : > { %v739_v35 = vmul.f32 %v3050_v12, %v2333_v50  ;;  %v823_v0 = vmul.f32 %v3051_v30, %v2407_v39  ;;  %v832_v36 = vmul.f32 %v3052_v33, %v2403_v1  ;;  %v3053_v45 = vmov %v3051_v30 }
 0x110   : > { %v822_v48 = vmul.f32 %v3053_v45, %v2403_v1  ;;  %v3054_v61 = vstv %s2023_s4  ;;  %v659_v14 = vadd.f32 %v2165_v10, %v589_v13  ;;  %v485_v42 = vadd.f32 %v483_v29, %v2215_v43  ;;  %s2548_s4 = sld [smem:[#allocation2 + $0x58]] }
 0x111   : > { %v842_v2 = vmul.f32 %v3054_v61, %v2403_v1  ;;  %v3055_v59 = vmov %v3054_v61  ;;  %v577_v18 = vadd.f32 %v575_v16, %v2176_v19  ;;  %v825_v11 = vadd.f32 %v823_v0, %v820_v21 }
 0x112   : > { %v843_v17 = vmul.f32 %v3055_v59, %v2407_v39  ;;  %v834_v47 = vadd.f32 %v832_v36, %v829_v7  ;;  %v824_v62 = vadd.f32 %v822_v48, %v819_v26  ;;  %v895_v20 = vsel %vm894_vm6, %v891_v5, %v893_v25  ;;  %v905_v26 = vpop.permute.xlu1 %904 }
 0x113   : > { %v844_v63 = vadd.f32 %v842_v2, %v839_v56  ;;  %v896_v8 = vsel %vm894_vm6, %v893_v25, %v891_v5  ;;  %v753_v10 = vadd.f32 %v751_v24, %v659_v14  ;;  %v3056_v19 = vperm.slane %v2079_v60, 0 }
 0x114   : > { %v845_v27 = vadd.f32 %v843_v17, %v840_v40  ;;  %v3057_v21 = vperm.slane %v2079_v60, 1  ;;  %v827_v56 = vadd.f32 %v825_v11, %v733_v58  ;;  %v836_v5 = vadd.f32 %v834_v47, %v742_v55 }
 0x115   : > { %v2443_v43 = vmul.f32 %v3056_v19, %v895_v20  ;;  %v908_v40 = vsel %vm894_vm6, %v905_v26, %v907_v28  ;;  %v909_v38 = vsel %vm894_vm6, %v907_v28, %v905_v26  ;;  %v826_v44 = vadd.f32 %v824_v62, %v732_v23 }
 0x116   : > { %v2447_v7 = vmul.f32 %v3057_v21, %v896_v8  ;;  %v846_v13 = vadd.f32 %v844_v63, %v752_v9  ;;  %v3058_v58 = vmov %v3056_v19  ;;  %v3059_v24 = vmov %v3057_v21 }
 0x117   : > { %v2459_v55 = vmul.f32 %v908_v40, %v3058_v58  ;;  %v2463_v29 = vmul.f32 %v909_v38, %v3059_v24  ;;  %v3060_v32 = vstv %s2054_s10  ;;  %v3061_v12 = vstv %s2067_s6  ;;  %s2557_s10 = sld [smem:[#allocation2 + $0x59]] }
 0x118   : > { %v914_v16 = vmul.f32 %v3060_v32, %v2447_v7  ;;  %v923_v23 = vmul.f32 %v3061_v12, %v2443_v43  ;;  %v3062_v9 = vmov %v3060_v32  ;;  %v3063_v0 = vstv %s2144_s17  ;;  %s2565_s6 = sld [smem:[#allocation2 + $0x29]]  ;;  %s1619_s17 = smov 16  }
 0x119   : > { %v913_v30 = vmul.f32 %v3062_v9, %v2443_v43  ;;  %v933_v33 = vmul.f32 %v3063_v0, %v2443_v43  ;;  %v847_v36 = vadd.f32 %v845_v27, %v753_v10  ;;  %v3064_v60 = vmov %v3063_v0 }
 0x11a   : > { %v934_v45 = vmul.f32 %v3064_v60, %v2447_v7  ;;  %v3065_v48 = vstv %s2081_s7  ;;  %v3066_v2 = vstv %s2102_s23  ;;  %v3068_v25 = vstv %s2200_s20  ;;  %s2542_s23 = sld [smem:[#allocation2 + $0x28]] }
 0x11b   : > { %v917_v61 = vmul.f32 %v3065_v48, %v2463_v29  ;;  %v926_v14 = vmul.f32 %v3066_v2, %v2459_v55  ;;  %v3067_v59 = vmov %v3065_v48  ;;  %v936_v28 = vmul.f32 %v3068_v25, %v2459_v55  ;;  %s2574_s7 = sld [smem:[#allocation2 + $0x5a]] }
 0x11c   : > { %v916_v17 = vmul.f32 %v3067_v59, %v2459_v55  ;;  %v3069_v11 = vmov %v3068_v25  ;;  %v579_v62 = vadd.f32 %v577_v18, %v485_v42  ;;  %v741_v63 = vadd.f32 %v739_v35, %v2226_v51  ;;  %s2599_s20 = sld [smem:[#allocation2 + $0x2b]] }
 0x11d   : > { %v937_v47 = vmul.f32 %v3069_v11, %v2463_v29  ;;  %v3070_v20 = vstv %s1911_s9  ;;  %v919_v10 = vadd.f32 %v917_v61, %v914_v16  ;;  %v928_v27 = vadd.f32 %v926_v14, %v923_v23  ;;  %s2516_s9 = sld [smem:[#allocation2 + $0x27]] }
 0x11e   : > { %v830_v8 = vmul.f32 %v3070_v20, %v2346_v54  ;;  %v918_v19 = vadd.f32 %v916_v17, %v913_v30  ;;  %v938_v21 = vadd.f32 %v936_v28, %v933_v33  ;;  %v649_v40 = vadd.f32 %v2234_v57, %v579_v62  ;;  %3077 = sst [smem:[#allocation32_spill]] %s2565_s6 }
 0x11f   : > { %v939_v26 = vadd.f32 %v937_v47, %v934_v45  ;;  %v3071_v38 = vstv %s2006_s15  ;;  %v3072_v51 = vmov %v3061_v12  ;;  %v921_v18 = vadd.f32 %v919_v10, %v827_v56  ;;  %s2523_s15 = sld [smem:[#allocation2 + $0x56]] }
 0x120   : > { %v833_v42 = vmul.f32 %v3071_v38, %v2407_v39  ;;  %v924_v35 = vmul.f32 %v3072_v51, %v2447_v7  ;;  %v930_v58 = vadd.f32 %v928_v27, %v836_v5  ;;  %v920_v24 = vadd.f32 %v918_v19, %v826_v44  ;;  %3076 = sst [smem:[#allocation33_spill]] %s2542_s23  ;;  %v3078_v27 = vld [vmem:[#allocation37_spill] sm:$0xff] }
 0x121   : > { %v940_v32 = vadd.f32 %v938_v21, %v846_v13  ;;  %v941_v16 = vadd.f32 %v939_v26, %v847_v36  ;;  %v743_v57 = vadd.f32 %v741_v63, %v649_v40  ;;  %v3073_v23 = vmov %v3066_v2  ;;  %986 = vrot.lane.b32.xlu1 %v921_v18, %s1617_s29  ;;  %v3079_v21 = vld [vmem:[#allocation39_spill] sm:$0xff]  ;;  %v3081_v18 = vld [vmem:[#allocation45_spill] sm:$0xff] }
 0x122   : > { %v835_v12 = vadd.f32 %v833_v42, %v830_v8  ;;  %v927_v9 = vmul.f32 %v3073_v23, %v2463_v29  ;;  %1000 = vrot.lane.b32.xlu2 %v930_v58, %s1618_s30  ;;  %v3074_v56 = vstv %s2125_s28  ;;  %v603_v44 = vstv %s2455_s16  ;;  %984 = vrot.lane.b32.xlu0 %v920_v24, %s1617_s29  ;;  %v3082_v23 = vld [vmem:[#allocation25_spill] sm:$0xff]  ;;  %s3086_s29 = sld [smem:[#allocation27_spill]]  ;;  %s1621_s16 = smov 96  }
 0x123   : > { %v511_v5 = vmul.f32 %v3074_v56, %v2261_v49  ;;  %v670_v13 = vstv %s2439_s1  ;;  %v3075_v30 = vstv %s2181_s22  ;;  %v605_v60 = vmul.f32 %v603_v44, %v2281_v6  ;;  %v3083_v56 = vld [vmem:[#allocation26_spill] sm:$0xff]  ;;  %s2679_s1 = sld [smem:[#allocation2 + $0x5f]] }
 0x124   : > { %v520_v0 = vmul.f32 %v3075_v30, %v2257_v4  ;;  %v837_v33 = vadd.f32 %v835_v12, %v743_v57  ;;  %v929_v36 = vadd.f32 %v927_v9, %v924_v35  ;;  %v672_v45 = vmul.f32 %v670_v13, %v1767_v22 }
 0x125   : > { %v513_v48 = vadd.f32 %v511_v5, %v1931_v15  ;;  %v673_v61 = vstv %s2471_s5  ;;  %v767_v2 = vstv %s2482_s8  ;;  %v858_v14 = vstv %s2449_s12  ;;  %s2689_s12 = sld [smem:[#allocation2 + $0x60]] }
 0x126   : > { %v931_v59 = vadd.f32 %v929_v36, %v837_v33  ;;  %v607_v17 = vadd.f32 %v605_v60, %v2239_v46  ;;  %v675_v25 = vmul.f32 %v673_v61, %v1777_v34  ;;  %v769_v28 = vmul.f32 %v767_v2, %v2333_v50  ;;  %s2697_s5 = sld [smem:[#allocation2 + $0x61]] }
 0x127   : > { %v515_v15 = vadd.f32 %v513_v48, %v2229_v3  ;;  %v860_v11 = vmul.f32 %v858_v14, %v2346_v54  ;;  %v861_v47 = vstv %s2496_s21  ;;  %v952_v62 = vstv %s2507_s25  ;;  %s3100_s8 = sld [smem:[#allocation34_spill]]  ;;  %s1622_s25 = smov 80  }
 0x128   : > { %v677_v46 = vadd.f32 %v675_v25, %v672_v45  ;;  %v771_v63 = vadd.f32 %v769_v28, %v2250_v31  ;;  %v863_v20 = vmul.f32 %v861_v47, %v2407_v39  ;;  %v954_v8 = vmul.f32 %v952_v62, %v2447_v7  ;;  %s3102_s21 = sld [smem:[#allocation29_spill]] }
 0x129   : > { %v609_v3 = vadd.f32 %v607_v17, %v515_v15  ;;  %v955_v10 = vstv %s2518_s26  ;;  %v522_v19 = vadd.f32 %v520_v0, %v3078_v27  ;;  %v3080_v26 = vstv %s2167_s18  ;;  %1018 = vrot.lane.b32.xlu1 %v940_v32, %s1619_s17  ;;  %v3084_v0 = vld [vmem:[#allocation43_spill] sm:$0xff]  ;;  %s1281_s26 = sld [smem:[#allocation2 + $0x15]] }
 0x12a   : > { %v611_v40 = vmul.f32 %v3080_v26, %v3079_v21  ;;  %v865_v31 = vadd.f32 %v863_v20, %v860_v11  ;;  %v957_v38 = vmul.f32 %v955_v10, %v2463_v29  ;;  %v613_v42 = vstv %s2523_s15  ;;  %1020 = vrot.lane.b32.xlu2 %v941_v16, %s1619_s17  ;;  %1002 = vrot.lane.b32.xlu0 %v931_v59, %s1618_s30  ;;  %s2620_s30 = sld [smem:[#allocation2 + $0x5b]]  ;;  %v3087_v20 = vld [vmem:[#allocation35_spill] sm:$0xff] }
 0x12b   : > { %v680_v51 = vstv %s2505_s24  ;;  %v679_v35 = vadd.f32 %v677_v46, %v609_v3  ;;  %v524_v58 = vadd.f32 %v522_v19, %v3081_v18  ;;  %v614_v24 = vmul.f32 %v613_v42, %v2277_v53  ;;  %s2627_s17 = sld [smem:[#allocation2 + $0x2e]] }
 0x12c   : > { %v683_v57 = vstv %s2531_s14  ;;  %v959_v12 = vadd.f32 %v957_v38, %v954_v8  ;;  %v681_v9 = vmul.f32 %v680_v51, %v3082_v23  ;;  %v2961_v16 = vstv %s2516_s9  ;;  %v3089_v38 = vld [vmem:[#allocation41_spill] sm:$0xff]  ;;  %s1282_s24 = sld [smem:[#allocation2 + $0x16]] }
 0x12d   : > { %v684_v32 = vmul.f32 %v683_v57, %v3083_v56  ;;  %v773_v5 = vadd.f32 %v771_v63, %v679_v35  ;;  %v616_v30 = vadd.f32 %v614_v24, %v611_v40  ;;  %v775_v33 = vmul.f32 %v2961_v16, %v3084_v0  ;;  %s1332_s15 = sld [smem:[#allocation2 + $0x48]] }
 0x12e   : > { %v2962_v36 = vstv %s2548_s4  ;;  %v2959_v48 = vstv %s2542_s23  ;;  %v2960_v59 = vstv %s2557_s10  ;;  %v2957_v46 = vstv %s2565_s6  ;;  %s2632_s23 = sld [smem:[#allocation2 + $0x2d]]  ;;  %s1620_s6 = smov 112  }
 0x12f   : > { %v686_v60 = vadd.f32 %v684_v32, %v681_v9  ;;  %v778_v45 = vmul.f32 %v2962_v36, %v2329_v52  ;;  %v867_v17 = vadd.f32 %v865_v31, %v773_v5  ;;  %v618_v25 = vadd.f32 %v616_v30, %v524_v58  ;;  %v3091_v58 = vld [vmem:[#allocation31_spill] sm:$0xff]  ;;  %s2780_s14 = sld [smem:[#allocation2 + $0x17]] }
 0x130   : > { %v869_v28 = vmul.f32 %v2959_v48, %v2342_v41  ;;  %v872_v15 = vmul.f32 %v2960_v59, %v2403_v1  ;;  %v2958_v63 = vstv %s2574_s7  ;;  %v3088_v8 = vstv %s3085_s19  ;;  %s2646_s19 = sld [smem:[#allocation2 + $0x5c]] }
 0x131   : > { %v780_v11 = vadd.f32 %v778_v45, %v775_v33  ;;  %v419_v3 = vmul.f32 %v3088_v8, %v3087_v20  ;;  %v961_v27 = vadd.f32 %v959_v12, %v867_v17  ;;  %v688_v19 = vadd.f32 %v686_v60, %v618_v25 }
 0x132   : > { %v874_v26 = vadd.f32 %v872_v15, %v869_v28  ;;  %v963_v40 = vmul.f32 %v2957_v46, %v2443_v43  ;;  %v966_v31 = vmul.f32 %v2958_v63, %v2459_v55  ;;  %v3090_v35 = vstv %s1964_s13  ;;  %s2663_s13 = sld [smem:[#allocation2 + $0x5e]] }
 0x133   : > { %v422_v18 = vmul.f32 %v3090_v35, %v3089_v38  ;;  %v3092_v24 = vstv %s3086_s29  ;;  %v3093_v32 = vstv %s2125_s28  ;;  %1040 = vrot.lane.b32.xlu1 %v961_v27, %s1620_s6  ;;  %v782_v5 = vadd.f32 %v780_v11, %v688_v19  ;;  %s2658_s28 = sld [smem:[#allocation2 + $0x5d]] }
 0x134   : > { %v507_v9 = vmul.f32 %v3092_v24, %v3091_v58  ;;  %v510_v12 = vmul.f32 %v3093_v32, %v2257_v4  ;;  %v3094_v30 = vstv %s2038_s3  ;;  %v604_v60 = vmul.f32 %v603_v44, %v2277_v53  ;;  %s2671_s3 = sld [smem:[#allocation2 + $0x2f]] }
 0x135   : > { %v601_v33 = vmul.f32 %v3094_v30, %v3079_v21  ;;  %v671_v45 = vmul.f32 %v670_v13, %v3082_v23  ;;  %v968_v17 = vadd.f32 %v966_v31, %v963_v40  ;;  %v424_v25 = vadd.f32 %v422_v18, %v419_v3  ;;  %s3116_s29 = sld [smem:[#allocation18_spill]] }
 0x136   : > { %v512_v28 = vadd.f32 %v510_v12, %v507_v9  ;;  %v674_v15 = vmul.f32 %v673_v61, %v3083_v56  ;;  %v876_v11 = vadd.f32 %v874_v26, %v782_v5  ;;  %v3095_v44 = vstv %s2097_s27  ;;  %s2687_s27 = sld [smem:[#allocation2 + $0x30]] }
 0x137   : > { %v606_v8 = vadd.f32 %v604_v60, %v601_v33  ;;  %v765_v27 = vmul.f32 %v3095_v44, %v3084_v0  ;;  %v768_v13 = vmul.f32 %v767_v2, %v2329_v52  ;;  %v859_v40 = vmul.f32 %v858_v14, %v2342_v41 }
 0x138   : > { %v514_v3 = vadd.f32 %v512_v28, %v424_v25  ;;  %v676_v19 = vadd.f32 %v674_v15, %v671_v45  ;;  %v862_v61 = vmul.f32 %v861_v47, %v2403_v1  ;;  %v970_v26 = vadd.f32 %v968_v17, %v876_v11 }
 0x139   : > { %v770_v31 = vadd.f32 %v768_v13, %v765_v27  ;;  %v953_v35 = vmul.f32 %v952_v62, %v2443_v43  ;;  %v956_v2 = vmul.f32 %v955_v10, %v2459_v55  ;;  %v434_v47 = vstv %s2605_s0  ;;  %s2816_s0 = sld [smem:[#allocation2 + $0x4c]] }
 0x13a   : > { %v608_v18 = vadd.f32 %v606_v8, %v514_v3  ;;  %v864_v14 = vadd.f32 %v862_v61, %v859_v40  ;;  %v437_v24 = vstv %s2620_s30  ;;  %1056 = vrot.lane.b32.xlu2 %v970_v26, %s1621_s16  ;;  %v435_v62 = vmul.f32 %v434_v47, %v3087_v20  ;;  %s3117_s30 = sld [smem:[#allocation23_spill]] }
 0x13b   : > { %v958_v9 = vadd.f32 %v956_v2, %v953_v35  ;;  %v438_v10 = vmul.f32 %v437_v24, %v3089_v38  ;;  %v526_v32 = vstv %s2599_s20  ;;  %v529_v30 = vstv %s2646_s19  ;;  %s2812_s20 = sld [smem:[#allocation2 + $0x1a]] }
 0x13c   : > { %v678_v12 = vadd.f32 %v676_v19, %v608_v18  ;;  %v527_v5 = vmul.f32 %v526_v32, %v3091_v58  ;;  %v620_v33 = vstv %s2612_s2  ;;  %v530_v45 = vmul.f32 %v529_v30, %v2257_v4  ;;  %s2819_s2 = sld [smem:[#allocation2 + $0x1b]] }
 0x13d   : > { %v440_v60 = vadd.f32 %v438_v10, %v435_v62  ;;  %v621_v17 = vmul.f32 %v620_v33, %v3079_v21  ;;  %v623_v25 = vstv %s2658_s28  ;;  %v690_v11 = vstv %s2632_s23  ;;  %s2782_s23 = sld [smem:[#allocation2 + $0x18]] }
 0x13e   : > { %v772_v28 = vadd.f32 %v770_v31, %v678_v12  ;;  %v624_v15 = vmul.f32 %v623_v25, %v2277_v53  ;;  %v693_v8 = vstv %s2663_s13  ;;  %v532_v44 = vadd.f32 %v530_v45, %v527_v5  ;;  %s3118_s13 = sld [smem:[#allocation49_spill]] }
 0x13f   : > { %v691_v27 = vmul.f32 %v690_v11, %v3082_v23  ;;  %v694_v13 = vmul.f32 %v693_v8, %v3083_v56  ;;  %v784_v3 = vstv %s2627_s17  ;;  %v787_v26 = vstv %s2679_s1  ;;  %s1366_s17 = sshll.u32 %s3116_s29, 3 }
 0x140   : > { %v866_v19 = vadd.f32 %v864_v14, %v772_v28  ;;  %v626_v40 = vadd.f32 %v624_v15, %v621_v17  ;;  %v785_v61 = vmul.f32 %v784_v3, %v3084_v0  ;;  %v534_v35 = vadd.f32 %v532_v44, %v440_v60  ;;  %v3096_v28 = vld [vmem:[#allocation36_spill] sm:$0xff]  ;;  %v3097_v15 = vld [vmem:[#allocation42_spill] sm:$0xff] }
 0x141   : > { %v696_v31 = vadd.f32 %v694_v13, %v691_v27  ;;  %v788_v2 = vmul.f32 %v787_v26, %v2329_v52  ;;  %v878_v18 = vstv %s2671_s3  ;;  %v881_v12 = vstv %s2689_s12  ;;  %v3098_v27 = vld [vmem:[#allocation30_spill] sm:$0xff]  ;;  %s3121_s12 = sshll.u32 %s3117_s30, 3 }
 0x142   : > { %v960_v62 = vadd.f32 %v958_v9, %v866_v19  ;;  %v879_v10 = vmul.f32 %v878_v18, %v2342_v41  ;;  %v972_v5 = vstv %s2687_s27  ;;  %v628_v45 = vadd.f32 %v626_v40, %v534_v35  ;;  %v3099_v35 = vld [vmem:[#allocation40_spill] sm:$0xff] }
 0x143   : > { %v790_v46 = vadd.f32 %v788_v2, %v785_v61  ;;  %v882_v63 = vmul.f32 %v881_v12, %v2403_v1  ;;  %v973_v14 = vmul.f32 %v972_v5, %v2443_v43  ;;  %v975_v17 = vstv %s2697_s5 }
 0x144   : > { %1038 = vrot.lane.b32.xlu0 %v960_v62, %s1620_s6  ;;  %v436_v60 = vmul.f32 %v434_v47, %v3096_v28  ;;  %v439_v44 = vmul.f32 %v437_v24, %v3097_v15  ;;  %v528_v13 = vmul.f32 %v526_v32, %v3098_v27  ;;  %v698_v9 = vadd.f32 %v696_v31, %v628_v45  ;;  %s2800_s6 = sld [smem:[#allocation2 + $0x19]]  ;;  %s3119_s3 = smov %s3118_s13 }
 0x145   : > { %v884_v19 = vadd.f32 %v882_v63, %v879_v10  ;;  %v976_v48 = vmul.f32 %v975_v17, %v2459_v55  ;;  %v531_v40 = vmul.f32 %v529_v30, %v2261_v49  ;;  %v622_v2 = vmul.f32 %v620_v33, %v3099_v35  ;;  %v3101_v63 = vld [vmem:[#allocation44_spill] sm:$0xff]  ;;  %s1149_s1 = scalar_lea.hbm %s3118_s13, %s1366_s17 }
 0x146   : > { %v441_v61 = vadd.f32 %v439_v44, %v436_v60  ;;  %v625_v59 = vmul.f32 %v623_v25, %v2281_v6  ;;  %v692_v62 = vmul.f32 %v690_v11, %v1767_v22  ;;  %v792_v16 = vadd.f32 %v790_v46, %v698_v9 }
 0x147   : > { %v978_v36 = vadd.f32 %v976_v48, %v973_v14  ;;  %v533_v47 = vadd.f32 %v531_v40, %v528_v13  ;;  %v695_v24 = vmul.f32 %v693_v8, %v1777_v34  ;;  %v786_v31 = vmul.f32 %v784_v3, %v3101_v63 }
 0x148   : > { %v627_v32 = vadd.f32 %v625_v59, %v622_v2  ;;  %v789_v30 = vmul.f32 %v787_v26, %v2333_v50  ;;  %v886_v10 = vadd.f32 %v884_v19, %v792_v16  ;;  %v883_v25 = vmul.f32 %v881_v12, %v2407_v39 }
 0x149   : > { %v535_v33 = vadd.f32 %v533_v47, %v441_v61  ;;  %v697_v45 = vadd.f32 %v695_v24, %v692_v62  ;;  %v880_v46 = vmul.f32 %v878_v18, %v2346_v54  ;;  %v974_v11 = vmul.f32 %v972_v5, %v2447_v7 }
 0x14a   : > { %v791_v48 = vadd.f32 %v789_v30, %v786_v31  ;;  %v980_v59 = vadd.f32 %v978_v36, %v886_v10  ;;  %v977_v3 = vmul.f32 %v975_v17, %v2463_v29  ;;  %v3103_v16 = vstv %s2136_s11  ;;  %s3108_s11 = sld [smem:[#allocation33_spill]] }
 0x14b   : > { %v629_v8 = vadd.f32 %v627_v32, %v535_v33  ;;  %v431_v26 = vmul.f32 %v3103_v16, %v3097_v15  ;;  %v885_v14 = vadd.f32 %v883_v25, %v880_v46  ;;  %v3104_v60 = vstv %s3100_s8  ;;  %s1153_s8 = sshll.u32 %s1149_s1, 4  ;;  %s1154_s8 = int_to_ptr.hbm [resolvable:$true] %s1153_s8 }
 0x14c   : > { %v428_v12 = vmul.f32 %v3104_v60, %v3096_v28  ;;  %v3105_v44 = vstv %s3102_s21  ;;  %v3106_v18 = vstv %s2181_s22  ;;  %1074 = vrot.lane.b32.xlu1 %v980_v59, %s1622_s25  ;;  %v3107_v5 = vstv %s2167_s18  ;;  %s3110_s22 = sld [smem:[#allocation32_spill]]  ;;  %s1138_s21 = scalar_lea.sflag [#allocation4], %s3117_s30 }
 0x14d   : > { %v518_v13 = vmul.f32 %v3105_v44, %v3098_v27  ;;  %v521_v9 = vmul.f32 %v3106_v18, %v2261_v49  ;;  %v699_v36 = vadd.f32 %v697_v45, %v629_v8  ;;  %v612_v17 = vmul.f32 %v3107_v5, %v3099_v35  ;;  %s1331_s18 = sld [smem:[#allocation2 + $0x47]] }
 0x14e   : > { %v615_v19 = vmul.f32 %v613_v42, %v2281_v6  ;;  %v682_v40 = vmul.f32 %v680_v51, %v1767_v22  ;;  %v433_v61 = vadd.f32 %v431_v26, %v428_v12  ;;  %v685_v62 = vmul.f32 %v683_v57, %v1777_v34 }
 0x14f   : > { %v523_v2 = vadd.f32 %v521_v9, %v518_v13  ;;  %v3109_v47 = vstv %s2548_s4  ;;  %v793_v32 = vadd.f32 %v791_v48, %v699_v36  ;;  %v979_v31 = vadd.f32 %v977_v3, %v974_v11  ;;  %s2784_s4 = sld [smem:[#allocation2 + $0x49]] }
 0x150   : > { %v779_v24 = vmul.f32 %v3109_v47, %v2333_v50  ;;  %v617_v30 = vadd.f32 %v615_v19, %v612_v17  ;;  %v687_v33 = vadd.f32 %v685_v62, %v682_v40  ;;  %v3111_v42 = vstv %s2516_s9  ;;  %s1330_s9 = sld [smem:[#allocation2 + $0x46]] }
 0x151   : > { %v525_v10 = vadd.f32 %v523_v2, %v433_v61  ;;  %v776_v45 = vmul.f32 %v3111_v42, %v3101_v63  ;;  %v3112_v51 = vstv %s2557_s10  ;;  %v887_v46 = vadd.f32 %v885_v14, %v793_v32  ;;  %s2792_s10 = sld [smem:[#allocation2 + $0x4a]] }
 0x152   : > { %v873_v25 = vmul.f32 %v3112_v51, %v2407_v39  ;;  %v3113_v57 = vstv %s3108_s11  ;;  %v3114_v26 = vstv %s2574_s7  ;;  %v3115_v12 = vstv %s3110_s22  ;;  %s2807_s7 = sld [smem:[#allocation2 + $0x4b]] }
 0x153   : > { %v619_v59 = vadd.f32 %v617_v30, %v525_v10  ;;  %v781_v8 = vadd.f32 %v779_v24, %v776_v45  ;;  %v870_v16 = vmul.f32 %v3113_v57, %v2346_v54  ;;  %v967_v60 = vmul.f32 %v3114_v26, %v2463_v29 }
 0x154   : > { %v981_v48 = vadd.f32 %v979_v31, %v887_v46  ;;  %v964_v44 = vmul.f32 %v3115_v12, %v2447_v7  ;;  %v499_v14 = vstv %s1331_s18  ;;  %v496_v17 = vstv %s1282_s24  ;;  %s1551_s24 = scalar_lea.hbm %s3119_s3, 16 }
 0x155   : > { %v689_v11 = vadd.f32 %v687_v33, %v619_v59  ;;  %v875_v3 = vadd.f32 %v873_v25, %v870_v16  ;;  %v410_v19 = vstv %s1281_s26  ;;  %v500_v40 = vmul.f32 %v499_v14, %v2257_v4 }
 0x156   : > { %1076 = vrot.lane.b32.xlu2 %v981_v48, %s1622_s25  ;;  %v969_v18 = vadd.f32 %v967_v60, %v964_v44  ;;  %v413_v5 = vstv %s1330_s9  ;;  %v501_v61 = vmul.f32 %v499_v14, %v2261_v49  ;;  %v497_v47 = vmul.f32 %v496_v17, %v3091_v58  ;;  %v999_v44 = vld [vmem:[#allocation6 + $0x10] ss:$8 sm:$0x3]  ;;  %s1545_s25 = sshra.s32 %s1154_s8, 4  ;;  %s1546_s25 = int_to_ptr.hbm [resolvable:$true] %s1545_s25 }
 0x157   : > { %v783_v13 = vadd.f32 %v781_v8, %v689_v11  ;;  %v414_v62 = vmul.f32 %v413_v5, %v3089_v38  ;;  %v593_v24 = vstv %s1332_s15  ;;  %v411_v32 = vmul.f32 %v410_v19, %v3087_v20  ;;  %s1547_s11 = scalar_lea.hbm %s1546_s25, 8  ;;  %p1552_p9 = scmp.lt.s32.totalorder %s1546_s25, %s3119_s3 }
 0x158   : > { %v415_v31 = vmul.f32 %v413_v5, %v3097_v15  ;;  %v498_v30 = vmul.f32 %v496_v17, %v3098_v27  ;;  %v412_v49 = vmul.f32 %v410_v19, %v3096_v28  ;;  %v502_v33 = vadd.f32 %v500_v40, %v497_v47  ;;  %p1548_p1 = scmp.ne.s32.totalorder %s1546_s25, %s1547_s11  ;;  %p1553_p10 = scmp.lt.s32.totalorder %s1551_s24, %s1547_s11 }
 0x159   : > { %v877_v9 = vadd.f32 %v875_v3, %v783_v13  ;;  %v590_v42 = vstv %s2780_s14  ;;  %v660_v45 = vstv %s2782_s23  ;;  %v594_v58 = vmul.f32 %v593_v24, %v2277_v53 }
 0x15a   : > { %v503_v38 = vadd.f32 %v501_v61, %v498_v30  ;;  %v595_v51 = vmul.f32 %v593_v24, %v2281_v6  ;;  %v663_v20 = vstv %s2784_s4  ;;  %v416_v25 = vadd.f32 %v414_v62, %v411_v32  ;;  %p1549_p4 = pnand %p1548_p1, %p1712_p5  ;;  %p1554_p2 = por %p1553_p10, %p1552_p9 }
 0x15b   : > { %v971_v36 = vadd.f32 %v969_v18, %v877_v9  ;;  %v417_v15 = vadd.f32 %v415_v31, %v412_v49  ;;  %v591_v27 = vmul.f32 %v590_v42, %v3079_v21  ;;  %v592_v46 = vmul.f32 %v590_v42, %v3099_v35  ;;  %v983_v9 = vld [vmem:[#allocation6 + $0x7] ss:$8 sm:$0x3]  ;;  %v1017_v49 = vld [vmem:[#allocation6 + $0x11] ss:$8 sm:$0x3] }
 0x15c   : > { %v504_v28 = vadd.f32 %v502_v33, %v416_v25  ;;  %v661_v59 = vmul.f32 %v660_v45, %v3082_v23  ;;  %v662_v8 = vmul.f32 %v660_v45, %v1767_v22  ;;  %v664_v53 = vmul.f32 %v663_v20, %v3083_v56  ;;  %p1550_p8 = pneg %p1549_p4 }
 0x15d   : > { %1058 = vrot.lane.b32.xlu0 %v971_v36, %s1621_s16  ;;  %v505_v6 = vadd.f32 %v503_v38, %v417_v15  ;;  %v596_v57 = vadd.f32 %v594_v58, %v591_v27  ;;  %v597_v16 = vadd.f32 %v595_v51, %v592_v46  ;;  %v665_v26 = vmul.f32 %v663_v20, %v1777_v34  ;;  %s219_s16 = scalar_lea.vmem [#allocation9], %s3121_s12 }
 0x15e   : > { %v757_v21 = vstv %s2792_s10  ;;  %v666_v60 = vadd.f32 %v664_v53, %v661_v59  ;;  %v754_v22 = vstv %s2800_s6  ;;  %v851_v18 = vstv %s2807_s7  ;;  %s1151_s5 = sshll.u32 %s219_s16, 4  ;;  %p1555_p11 = pnand %p1554_p2, %p1550_p8  ;;  %s1152_s5 = int_to_ptr.vmem [resolvable:$true] %s1151_s5 }
 0x15f   : > { %v598_v48 = vadd.f32 %v596_v57, %v504_v28  ;;  %v599_v11 = vadd.f32 %v597_v16, %v505_v6  ;;  %v667_v23 = vadd.f32 %v665_v26, %v662_v8  ;;  %v758_v12 = vmul.f32 %v757_v21, %v2329_v52  ;;  %v1037_v8 = vld [vmem:[#allocation6 + $0x13] ss:$8 sm:$0x3] }
 0x160   : > { %v755_v34 = vmul.f32 %v754_v22, %v3084_v0  ;;  %v759_v13 = vmul.f32 %v757_v21, %v2333_v50  ;;  %v756_v5 = vmul.f32 %v754_v22, %v3101_v63  ;;  %v848_v17 = vstv %s2812_s20 }
 0x161   : > { %v668_v36 = vadd.f32 %v666_v60, %v598_v48  ;;  %v669_v14 = vadd.f32 %v667_v23, %v599_v11  ;;  %v1008_v19 = vperm.slane %v999_v44, 0  ;;  %v1009_v40 = vperm.slane %v999_v44, 1  ;;  %v1073_v44 = vld [vmem:[#allocation6 + $0x15] ss:$8 sm:$0x3] }
 0x162   : > { %v760_v52 = vadd.f32 %v758_v12, %v755_v34  ;;  %v852_v0 = vmul.f32 %v851_v18, %v2403_v1  ;;  %v853_v50 = vmul.f32 %v851_v18, %v2407_v39  ;;  %v992_v47 = vperm.slane %v983_v9, 0 }
 0x163   : > { %v993_v24 = vperm.slane %v983_v9, 1  ;;  %v761_v32 = vadd.f32 %v759_v13, %v756_v5  ;;  %v945_v31 = vstv %s2816_s0  ;;  %v849_v33 = vmul.f32 %v848_v17, %v2342_v41 }
 0x164   : > { %v850_v42 = vmul.f32 %v848_v17, %v2346_v54  ;;  %v942_v38 = vstv %s2819_s2  ;;  %v946_v51 = vmul.f32 %v945_v31, %v2459_v55  ;;  %v947_v20 = vmul.f32 %v945_v31, %v2463_v29 }
 0x165   : > { %v854_v39 = vadd.f32 %v852_v0, %v849_v33  ;;  %v1027_v27 = vperm.slane %v1017_v49, 1  ;;  %v943_v28 = vmul.f32 %v942_v38, %v2443_v43  ;;  %v944_v59 = vmul.f32 %v942_v38, %v2447_v7  ;;  %v1055_v43 = vld [vmem:[#allocation6 + $0x14] ss:$8 sm:$0x3] }
 0x166   : > { %v855_v58 = vadd.f32 %v853_v50, %v850_v42  ;;  %v762_v29 = vadd.f32 %v760_v52, %v668_v36  ;;  %v763_v6 = vadd.f32 %v761_v32, %v669_v14  ;;  %v1046_v60 = vperm.slane %v1037_v8, 0 }
 0x167   : > { %v948_v57 = vadd.f32 %v946_v51, %v943_v28  ;;  %v949_v16 = vadd.f32 %v947_v20, %v944_v59  ;;  %v1047_v48 = vperm.slane %v1037_v8, 1  ;;  %v1064_v9 = vperm.slane %v1055_v43, 0 }
 0x168   : > { %v856_v11 = vadd.f32 %v854_v39, %v762_v29  ;;  %v857_v23 = vadd.f32 %v855_v58, %v763_v6  ;;  %v1065_v36 = vperm.slane %v1055_v43, 1 }
 0x16a   : > { %v951_v12 = vadd.f32 %v949_v16, %v857_v23  ;;  %v3122_v23 = vld [vmem:[#allocation24_spill] sm:$0xff] }
 0x17c   : > { %v1001_v10 = vpop.permute.xlu2 %1000 }
 0x184   : > { %v1021_v3 = vpop.permute.xlu2 %1020 }
 0x193   : > { %v2788_v2 = vpop.permute.xlu1 %986 }
 0x194   : > { %v985_v4 = vpop.permute.xlu0 %984  ;;  %v1057_v25 = vpop.permute.xlu2 %1056 }
 0x195   : > { %v989_v30 = vsel %vm988_vm8, %v985_v4, %v2788_v2  ;;  %v990_v63 = vsel %vm988_vm8, %v2788_v2, %v985_v4  ;;  %v1026_v4 = vperm.slane %v1017_v49, 0 }
 0x196   : > { %v996_v15 = vmul.f32 %v992_v47, %v990_v63  ;;  %v997_v2 = vmul.f32 %v993_v24, %v989_v30 }
 0x19b   : > { %v1019_v35 = vpop.permute.xlu1 %1018 }
 0x19c   : > { %v1003_v56 = vpop.permute.xlu0 %1002  ;;  %v1023_v54 = vsel %vm1022_vm9, %v1019_v35, %v1021_v3  ;;  %v1024_v46 = vsel %vm1022_vm9, %v1021_v3, %v1019_v35 }
 0x19d   : > { %v1005_v61 = vsel %vm1004_vm7, %v1001_v10, %v1003_v56  ;;  %v1006_v62 = vsel %vm1004_vm7, %v1003_v56, %v1001_v10  ;;  %v1030_v26 = vmul.f32 %v1026_v4, %v1024_v46  ;;  %v1031_v21 = vmul.f32 %v1027_v27, %v1023_v54 }
 0x19e   : > { %v1012_v10 = vmul.f32 %v1008_v19, %v1006_v62  ;;  %v1013_v45 = vmul.f32 %v1009_v40, %v1005_v61  ;;  %v950_v56 = vadd.f32 %v948_v57, %v856_v11  ;;  %v1082_v19 = vperm.slane %v1073_v44, 0 }
 0x19f   : > { %v1083_v40 = vperm.slane %v1073_v44, 1 }
 0x1a0   : > { %v1014_v55 = vadd.f32 %v1012_v10, %v996_v15  ;;  %v1015_v53 = vadd.f32 %v1013_v45, %v997_v2 }
 0x1a2   : > { %v1032_v3 = vadd.f32 %v1030_v26, %v1014_v55  ;;  %v1033_v7 = vadd.f32 %v1031_v21, %v1015_v53 }
 0x1a4   : > { %v1034_v5 = vadd.f32 %v1032_v3, %v950_v56  ;;  %v1035_v17 = vadd.f32 %v1033_v7, %v951_v12 }
 0x1a5   : > { %v1041_v1 = vpop.permute.xlu1 %1040 }
 0x1b0   : > { %v1077_v14 = vpop.permute.xlu2 %1076 }
 0x1b6   : > { %v1039_v41 = vpop.permute.xlu0 %1038 }
 0x1b7   : > { %v1043_v35 = vsel %vm1042_vm10, %v1039_v41, %v1041_v1  ;;  %v1044_v22 = vsel %vm1042_vm10, %v1041_v1, %v1039_v41 }
 0x1b8   : > { %v1050_v34 = vmul.f32 %v1046_v60, %v1043_v35  ;;  %v1051_v13 = vmul.f32 %v1047_v48, %v1044_v22 }
 0x1ba   : > { %v1052_v47 = vadd.f32 %v1050_v34, %v1034_v5  ;;  %v1053_v24 = vadd.f32 %v1051_v13, %v1035_v17 }
 0x1be   : > { %v1075_v18 = vpop.permute.xlu1 %1074 }
 0x1bf   : > { %v1079_v61 = vsel %vm1078_vm11, %v1075_v18, %v1077_v14  ;;  %v1080_v62 = vsel %vm1078_vm11, %v1077_v14, %v1075_v18 }
 0x1c0   : > { %v1086_v37 = vmul.f32 %v1082_v19, %v1079_v61  ;;  %v1087_v30 = vmul.f32 %v1083_v40, %v1080_v62 }
 0x1cf   : > { %v1059_v52 = vpop.permute.xlu0 %1058 }
 0x1d0   : > { %v1061_v0 = vsel %vm1060_vm12, %v1057_v25, %v1059_v52  ;;  %v1062_v50 = vsel %vm1060_vm12, %v1059_v52, %v1057_v25 }
 0x1d1   : > { %v1068_v32 = vmul.f32 %v1064_v9, %v1061_v0  ;;  %v1069_v31 = vmul.f32 %v1065_v36, %v1062_v50 }
 0x1d3   : > { %v1070_v63 = vadd.f32 %v1068_v32, %v1052_v47  ;;  %v1071_v49 = vadd.f32 %v1069_v31, %v1053_v24 }
 0x1d5   : > { %v1088_v33 = vadd.f32 %v1086_v37, %v1070_v63  ;;  %v1089_v42 = vadd.f32 %v1087_v30, %v1071_v49 }
 0x1d7   : > { %v1358_v10 = vmul.f32 -1.442695, %v1088_v33  ;;  %v1359_v45 = vmul.f32 -1.442695, %v1089_v42 }
 0x1d9   : > { %1448 = vpow2.f32 %v1358_v10 }
 0x1da   : > { %1450 = vpow2.f32 %v1359_v45 }
 0x1df   : > { %v1449_v1 = vpop.eup %1448 }
 0x1e0   : > { %v1451_v38 = vpop.eup %1450  ;;  %v1096_v39 = vadd.f32 1.0, %v1449_v1 }
 0x1e1   : > { %v1097_v58 = vadd.f32 1.0, %v1451_v38 }
 0x1e2   : > { %1452 = vrcp.f32 %v1096_v39  ;;  %v1109_v41 = vand.u32 2147483648, %v1096_v39  ;;  %v1107_v46 = vand.u32 2147483647, %v1096_v39  ;;  %vm1103_vm15 = vweird.f32 %v1096_v39 }
 0x1e3   : > { %1454 = vrcp.f32 %v1097_v58  ;;  %v1124_v54 = vand.u32 2147483648, %v1097_v58  ;;  %v1122_v59 = vand.u32 2147483647, %v1097_v58  ;;  %vm1118_vm2 = vweird.f32 %v1097_v58 }
 0x1e4   : > { %v1110_v29 = vor.u32 1.1754944e-38, %v1109_v41  ;;  %vm1108_vm4 = vcmp.eq.f32.partialorder %v1107_v46, 8.507059e+37 }
 0x1e5   : > { %v1125_v6 = vor.u32 1.1754944e-38, %v1124_v54  ;;  %vm1123_vm5 = vcmp.eq.f32.partialorder %v1122_v59, 8.507059e+37 }
 0x1e8   : > { %v1453_v51 = vpop.eup %1452 }
 0x1e9   : > { %v1455_v20 = vpop.eup %1454  ;;  %v1099_v25 = vmul.f32 %v1453_v51, %v1096_v39  ;;  %vm1104_vm13 = vweird.f32 %v1453_v51 }
 0x1ea   : > { %v1114_v15 = vmul.f32 %v1455_v20, %v1097_v58  ;;  %vm1119_vm14 = vweird.f32 %v1455_v20  ;;  %vm1105_vm1 = vmor %vm1103_vm15, %vm1104_vm13 }
 0x1eb   : > { %v1100_v2 = vsub.f32 1.0, %v1099_v25  ;;  %vm1120_vm3 = vmor %vm1118_vm2, %vm1119_vm14 }
 0x1ec   : > { %v1115_v4 = vsub.f32 1.0, %v1114_v15 }
 0x1ed   : > { %v1101_v27 = vmul.f32 %v1453_v51, %v1100_v2 }
 0x1ee   : > { %v1116_v28 = vmul.f32 %v1455_v20, %v1115_v4 }
 0x1ef   : > { %v1102_v8 = vadd.f32 %v1453_v51, %v1101_v27 }
 0x1f0   : > { %v1117_v55 = vadd.f32 %v1455_v20, %v1116_v28 }
 0x1f1   : > { %v1106_v53 = vsel %vm1105_vm1, %v1453_v51, %v1102_v8 }
 0x1f2   : > { %v1121_v57 = vsel %vm1120_vm3, %v1455_v20, %v1117_v55  ;;  %v1111_v16 = vsel %vm1108_vm4, %v1110_v29, %v1106_v53 }
 0x1f3   : > { %v1126_v26 = vsel %vm1123_vm5, %v1125_v6, %v1121_v57  ;;  %v1128_v60 = vperm.slane %v1111_v16, 0 }
 0x1f4   : > { %v1129_v21 = vperm.slane %v1126_v26, 0 }
 0x1f6   : > { %v1132_v48 = vrot.slane %v1129_v21, 4 }
 0x1f8   : > { %v1133_v11 = vsel %vm227_vm0, %v1128_v60, %v1132_v48 }
 0x1f9   : > { %v1135_v35 = vmul.f32 %v1133_v11, %v3122_v23 }
 0x1fb   : > { %1136 = vst [vmem:[%s219_s16] sm:$0xff] %v1135_v35 }
 0x1fc   : > { %1558 = shalt.err (!%p1555_p11)
}
 0x1fd   : > { %1377 = dma.vmem_to_hbm [thread:$0]  (%p1712_p5), %s1152_s5, 128, %s1154_s8, %s1138_s21  }
 0x1fe PF: > { %s3123_s15 = sld [smem:[#allocation14_spill]] }
 0x1ff   : > { %s3125_s23 = sld [smem:[#allocation17_spill]] }
 0x204   : > { %s1165_s4 = sand.u32 1, %s3123_s15  }
 0x205   : > { %p3126_p12 = scmp.ge.s32.totalorder %s3125_s23, 2  ;;  %s1166_s10 = scalar_lea.sflag [#allocation4], %s1165_s4 }
 0x207   : > { %p1391_p13 = pnand %p3126_p12, %p1678_p6 }
 0x209   : > { %p1392_p0 = pneg %p1391_p13 }
 0x20b   : > { %1588 = dma.done.wait (%p1392_p0), %s1166_s10, 128  }
 0x20c   : > { %1590 = vsyncadd (%p1392_p0), %s1166_s10, 4294967168  ;;  %s3127_s15 = sld [smem:[#allocation20_spill]] }
 0x20d   : > { %s3128_s12 = sld [smem:[#allocation15_spill]] }
 0x20e   : > { %s3129_s13 = sld [smem:[#allocation16_spill]] }
 0x20f   : > { %s3130_s14 = sld [smem:[#allocation21_spill]] }
 0x212   : > { %p18_p3 = scmp.ge.s32.totalorder %s3127_s15, 4  }
 0x214   :  { %20 = sbr.rel (!%p18_p3) target bundleno = 12 (0xc), region = 98 }
 0x219   :  { %1172 = vsyncpa [#allocation3], 1 }
 0x21a   :  { %1174 = vsyncpa [#allocation3 + $0x1], 1 }
 0x21b   :  { %1175 = vsyncpa [#allocation8], 1 }
 0x21c   :  { %1177 = vsyncpa [#allocation8 + $0x1], 1 }
 0x21d   :  { %1178 = vsyncpa [#allocation4], 1 }
 0x21e   :  { %1180 = vsyncpa [#allocation4 + $0x1], 1 }
 0x21f   :  { %1181 = vsyncpa [#allocation5], 1 }
 0x220   :  { %1183 = vsyncpa [#allocation5 + $0x1], 1 }

</bundles_post_ra>
